<compile_context>
chip_gen: v7x
topology: tpu7x:2x2x1
jax: 0.10.0
libtpu: 0.0.40
codegen_flags: <defaults>
</compile_context>

<pallas_src>
import functools

import numpy as np
import jax
import jax.numpy as jnp
from jax.experimental import pallas as pl
from jax.experimental.pallas import tpu as pltpu

BN_EPS = 1e-5
VMEM_LIMIT_BYTES = 48 * 1024 * 1024   # < 64 MiB physical on v7x, > scoped default


def _round_up(x, m):
    return ((x + m - 1) // m) * m


def _pick_tm(m):
    return 512 if m >= 512 else _round_up(m, 8)


def _pick_tn(n):
    if n % 256 == 0:
        return 256
    if n % 128 == 0:
        return 128
    return n


def _pick_tk(k):
    if k <= 1024:
        return k
    for cand in (1024, 512, 256, 128):
        if k % cand == 0:
            return cand
    return k


# ---------------------------------------------------------------------------
# Pallas kernels (module-level, stable identities -> stable compile caching)
# ---------------------------------------------------------------------------

def _mm_bn_body(x_ref, w_ref, s_ref, b_ref, r_ref, o_ref, acc_ref, *, relu):
    # x: [TM, TK] bf16, w: [TK, TN] bf16, s/b: [1, TN] f32, acc: [TM, TN] f32
    k = pl.program_id(2)

    @pl.when(k == 0)
    def _():
        acc_ref[...] = jnp.zeros_like(acc_ref)

    acc_ref[...] += jnp.dot(x_ref[...], w_ref[...],
                            preferred_element_type=jnp.float32)

    @pl.when(k == pl.num_programs(2) - 1)
    def _():
        y = acc_ref[...] * s_ref[...] + b_ref[...]
        if r_ref is not None:
            y = y + r_ref[...].astype(jnp.float32)
        if relu:
            y = jnp.maximum(y, 0.0)
        o_ref[...] = y.astype(o_ref.dtype)


def _mm_bn_relu_kernel(x_ref, w_ref, s_ref, b_ref, o_ref, acc_ref):
    _mm_bn_body(x_ref, w_ref, s_ref, b_ref, None, o_ref, acc_ref, relu=True)


def _mm_bn_kernel(x_ref, w_ref, s_ref, b_ref, o_ref, acc_ref):
    _mm_bn_body(x_ref, w_ref, s_ref, b_ref, None, o_ref, acc_ref, relu=False)


def _mm_bn_res_relu_kernel(x_ref, w_ref, s_ref, b_ref, r_ref, o_ref, acc_ref):
    _mm_bn_body(x_ref, w_ref, s_ref, b_ref, r_ref, o_ref, acc_ref, relu=True)


def _mm_bn_res_kernel(x_ref, w_ref, s_ref, b_ref, r_ref, o_ref, acc_ref):
    _mm_bn_body(x_ref, w_ref, s_ref, b_ref, r_ref, o_ref, acc_ref, relu=False)


def _maxpool_kernel(x_ref, o_ref):
    # x: [9, TM, C] -> max over the 9 pooling taps
    o_ref[...] = jnp.max(x_ref[...], axis=0)


def _gap_kernel(x_ref, o_ref):
    # x: [1, H*W, C] -> mean over spatial positions (f32 accumulation)
    o_ref[...] = jnp.mean(x_ref[...].astype(jnp.float32), axis=1, keepdims=True)


# ---------------------------------------------------------------------------
# Cached pallas_call builders
# ---------------------------------------------------------------------------

@functools.lru_cache(maxsize=None)
def _matmul_bn_call(M_pad, K, N, TM, TN, TK, relu, has_residual, out_dtype):
    grid = (M_pad // TM, N // TN, K // TK)
    x_spec = pl.BlockSpec((TM, TK), lambda i, j, k: (i, k))
    w_spec = pl.BlockSpec((TK, TN), lambda i, j, k: (k, j))
    sb_spec = pl.BlockSpec((1, TN), lambda i, j, k: (0, j))
    o_spec = pl.BlockSpec((TM, TN), lambda i, j, k: (i, j))

    if has_residual:
        kern = _mm_bn_res_relu_kernel if relu else _mm_bn_res_kernel
        r_spec = pl.BlockSpec((TM, TN), lambda i, j, k: (i, j))
        in_specs = [x_spec, w_spec, sb_spec, sb_spec, r_spec]
    else:
        kern = _mm_bn_relu_kernel if relu else _mm_bn_kernel
        in_specs = [x_spec, w_spec, sb_spec, sb_spec]

    return pl.pallas_call(
        kern,
        out_shape=jax.ShapeDtypeStruct((M_pad, N), out_dtype),
        grid_spec=pltpu.PrefetchScalarGridSpec(
            num_scalar_prefetch=0,
            grid=grid,
            in_specs=in_specs,
            out_specs=o_spec,
            scratch_shapes=[pltpu.VMEM((TM, TN), jnp.float32)],
        ),
        compiler_params=pltpu.CompilerParams(
            dimension_semantics=("parallel", "parallel", "arbitrary"),
            vmem_limit_bytes=VMEM_LIMIT_BYTES,
        ),
    )


def matmul_bn(x, w, scale, bias, *, relu, residual=None, out_dtype=jnp.bfloat16):
    """(x @ w) * scale + bias (+ residual) (+ ReLU).

    x:[M,K] bf16, w:[K,N] bf16, scale/bias:[1,N] f32, residual:[M,N] bf16.
    Tiled (TM, TN, TK) with an f32 accumulator over the K grid axis.
    """
    M, K = x.shape
    _, N = w.shape
    TM, TN, TK = _pick_tm(M), _pick_tn(N), _pick_tk(K)
    M_pad = _round_up(M, TM)
    if M_pad != M:
        x = jnp.pad(x, ((0, M_pad - M), (0, 0)))
        if residual is not None:
            residual = jnp.pad(residual, ((0, M_pad - M), (0, 0)))

    call = _matmul_bn_call(M_pad, K, N, TM, TN, TK, bool(relu),
                           residual is not None, out_dtype)
    if residual is None:
        out = call(x, w, scale, bias)
    else:
        out = call(x, w, scale, bias, residual)
    return out[:M]


# ---------------------------------------------------------------------------
# Conv / pooling wrappers (glue: padding, patch extraction, reshapes)
# ---------------------------------------------------------------------------

def _im2col(x, k, stride, pad):
    # TODO(synk): for k>1 convs this still materializes the k*k-expanded patch
    # matrix in HBM (9x / 49x read amplification); a direct in-kernel tap-loop
    # conv would remove it.
    N, H, W, C = x.shape
    OH = (H + 2 * pad - k) // stride + 1
    OW = (W + 2 * pad - k) // stride + 1
    xp = jnp.pad(x, ((0, 0), (pad, pad), (pad, pad), (0, 0))) if pad > 0 else x
    cols = []
    for i in range(k):
        for j in range(k):
            cols.append(xp[:, i:i + stride * (OH - 1) + 1:stride,
                            j:j + stride * (OW - 1) + 1:stride, :])
    patches = jnp.concatenate(cols, axis=-1)          # [N, OH, OW, k*k*C]
    return patches.reshape(N * OH * OW, k * k * C), (N, OH, OW)


@functools.lru_cache(maxsize=None)
def _conv_bn_fn(k, stride, pad, relu, has_residual):
    """Jitted conv+bn(+res)(+relu) for one static config; shapes handled by jit."""
    def conv_impl(x, w, scale, bias, residual):
        if k == 1:
            xs = x[:, ::stride, ::stride, :] if stride > 1 else x
            N, OH, OW, C = xs.shape
            patches = xs.reshape(N * OH * OW, C)
        else:
            patches, (N, OH, OW) = _im2col(x, k, stride, pad)
        res2 = None
        if residual is not None:
            res2 = residual.reshape(N * OH * OW, residual.shape[-1])
        y = matmul_bn(patches, w, scale, bias, relu=relu, residual=res2)
        return y.reshape(N, OH, OW, w.shape[1])

    if has_residual:
        return jax.jit(conv_impl)
    return jax.jit(lambda x, w, scale, bias: conv_impl(x, w, scale, bias, None))


def conv_bn(x, p, *, stride, pad, relu, residual=None):
    """Conv2d(kxk, bias=False) + eval BatchNorm (+ residual) (+ ReLU)."""
    fn = _conv_bn_fn(p["k"], stride, pad, bool(relu), residual is not None)
    if residual is None:
        return fn(x, p["w"], p["scale"], p["bias"])
    return fn(x, p["w"], p["scale"], p["bias"], residual)


@jax.jit
def maxpool_3x3_s2_p1(x):
    N, H, W, C = x.shape
    OH = (H + 2 - 3) // 2 + 1
    OW = (W + 2 - 3) // 2 + 1
    xp = jnp.pad(x, ((0, 0), (1, 1), (1, 1), (0, 0)), constant_values=-jnp.inf)
    taps = [xp[:, i:i + 2 * (OH - 1) + 1:2, j:j + 2 * (OW - 1) + 1:2, :]
            for i in range(3) for j in range(3)]
    M = N * OH * OW
    stacked = jnp.stack(taps, axis=0).reshape(9, M, C)
    TM = min(512, _round_up(M, 8))
    M_pad = _round_up(M, TM)
    if M_pad != M:
        stacked = jnp.pad(stacked, ((0, 0), (0, M_pad - M), (0, 0)),
                          constant_values=-jnp.inf)
    out = pl.pallas_call(
        _maxpool_kernel,
        out_shape=jax.ShapeDtypeStruct((M_pad, C), x.dtype),
        grid_spec=pltpu.PrefetchScalarGridSpec(
            num_scalar_prefetch=0,
            grid=(M_pad // TM,),
            in_specs=[pl.BlockSpec((9, TM, C), lambda i: (0, i, 0))],
            out_specs=pl.BlockSpec((TM, C), lambda i: (i, 0)),
        ),
        compiler_params=pltpu.CompilerParams(
            dimension_semantics=("parallel",),
            vmem_limit_bytes=VMEM_LIMIT_BYTES,
        ),
    )(stacked)
    return out[:M].reshape(N, OH, OW, C)


@jax.jit
def global_avg_pool(x):
    N, H, W, C = x.shape
    x3 = x.reshape(N, H * W, C)
    out = pl.pallas_call(
        _gap_kernel,
        out_shape=jax.ShapeDtypeStruct((N, 1, C), jnp.float32),
        grid_spec=pltpu.PrefetchScalarGridSpec(
            num_scalar_prefetch=0,
            grid=(N,),
            in_specs=[pl.BlockSpec((1, H * W, C), lambda n: (n, 0, 0))],
            out_specs=pl.BlockSpec((1, 1, C), lambda n: (n, 0, 0)),
        ),
        compiler_params=pltpu.CompilerParams(
            dimension_semantics=("parallel",),
            vmem_limit_bytes=VMEM_LIMIT_BYTES,
        ),
    )(x3)
    return out.reshape(N, C)


# ---------------------------------------------------------------------------
# Deterministic parameter construction (synthetic weights, host-side numpy —
# avoids hundreds of tiny eager jax.random compiles)
# ---------------------------------------------------------------------------

def _make_conv_bn(rng, cin, cout, k):
    w = rng.standard_normal((k * k * cin, cout)).astype(np.float32)
    w *= np.sqrt(2.0 / (k * k * cin))
    gamma = rng.uniform(0.5, 1.5, size=(cout,)).astype(np.float32)
    beta = (0.1 * rng.standard_normal(cout)).astype(np.float32)
    running_mean = (0.1 * rng.standard_normal(cout)).astype(np.float32)
    running_var = rng.uniform(0.5, 1.5, size=(cout,)).astype(np.float32)
    scale = gamma / np.sqrt(running_var + BN_EPS)      # BN (eval) folded to affine
    bias = beta - running_mean * scale
    return {"k": k,
            "w": jnp.asarray(w, dtype=jnp.bfloat16),
            "scale": jnp.asarray(scale.reshape(1, cout)),
            "bias": jnp.asarray(bias.reshape(1, cout))}


def make_resnet50_params(seed, num_classes=1):
    rng = np.random.default_rng(seed)
    params = {"conv1": _make_conv_bn(rng, 3, 64, 7)}
    layer_cfg = [(64, 3, 1), (128, 4, 2), (256, 6, 2), (512, 3, 2)]
    in_ch = 64
    for li, (width, nblocks, stride) in enumerate(layer_cfg, start=1):
        blocks = []
        for b in range(nblocks):
            s = stride if b == 0 else 1
            out_ch = width * 4
            blk = {
                "stride": s,
                "conv1": _make_conv_bn(rng, in_ch, width, 1),
                "conv2": _make_conv_bn(rng, width, width, 3),
                "conv3": _make_conv_bn(rng, width, out_ch, 1),
            }
            if s != 1 or in_ch != out_ch:
                blk["down"] = _make_conv_bn(rng, in_ch, out_ch, 1)
            blocks.append(blk)
            in_ch = out_ch
        params[f"layer{li}"] = blocks
    fc_w = rng.standard_normal((in_ch, num_classes)).astype(np.float32) / np.sqrt(in_ch)
    fc_b = (0.01 * rng.standard_normal(num_classes)).astype(np.float32)
    params["fc"] = {"w": jnp.asarray(fc_w, dtype=jnp.bfloat16),
                    "scale": jnp.ones((1, num_classes), jnp.float32),
                    "bias": jnp.asarray(fc_b.reshape(1, num_classes))}
    return params


# ---------------------------------------------------------------------------
# Forward pass: torchvision resnet50 (eval) with ChannelLinear(2048, num_classes)
# ---------------------------------------------------------------------------

def _bottleneck(x, blk):
    out = conv_bn(x, blk["conv1"], stride=1, pad=0, relu=True)
    out = conv_bn(out, blk["conv2"], stride=blk["stride"], pad=1, relu=True)
    if "down" in blk:
        identity = conv_bn(x, blk["down"], stride=blk["stride"], pad=0, relu=False)
    else:
        identity = x
    # conv3 + BN + residual add + ReLU fused in a single matmul epilogue.
    return conv_bn(out, blk["conv3"], stride=1, pad=0, relu=True, residual=identity)


def resnet50_custom_forward(x_nchw, params):
    """Mirrors ResNet50Custom.forward: resnet50 trunk + ChannelLinear head."""
    x = jnp.transpose(x_nchw, (0, 2, 3, 1)).astype(jnp.bfloat16)  # NCHW -> NHWC bf16
    x = conv_bn(x, params["conv1"], stride=2, pad=3, relu=True)   # conv1+bn1+relu
    x = maxpool_3x3_s2_p1(x)
    for name in ("layer1", "layer2", "layer3", "layer4"):
        for blk in params[name]:
            x = _bottleneck(x, blk)
    feat = global_avg_pool(x)                                     # [N, 2048] == flatten(1)
    # ChannelLinear: x.flatten(1) @ W.T + b, then view(N, -1)
    logits = matmul_bn(feat.astype(jnp.bfloat16), params["fc"]["w"],
                       params["fc"]["scale"], params["fc"]["bias"],
                       relu=False, out_dtype=jnp.float32)
    return logits                                                 # [N, num_classes]


# TODO(synk): ResNet50Custom.apply (PIL sliding-window crops + host-side weighted
# averaging of logits) is host preprocessing, not device compute; only forward()
# is implemented here.

if __name__ == "__main__":
    key = jax.random.PRNGKey(0)
    # Small, valid shapes: batch=2, 3 input channels (resnet conv1), 32x32 spatial.
    x = jax.random.normal(key, (2, 3, 32, 32), jnp.float32)       # NCHW like PyTorch
    params = make_resnet50_params(0, num_classes=1)
    out = resnet50_custom_forward(x, params)
    out = jax.block_until_ready(out)
    assert out.shape == (2, 1), out.shape
    assert bool(jnp.all(jnp.isfinite(out)))
    print("KERNEL_OK")
</pallas_src>

<mosaic_0001>
module attributes {stable_mosaic.version = 11 : i64} {
  func.func @_mm_bn_relu_kernel(%arg0: i32, %arg1: i32, %arg2: i32, %arg3: memref<512x147xbf16, #tpu.memory_space<vmem>>, %arg4: memref<147x64xbf16, #tpu.memory_space<vmem>>, %arg5: memref<1x64xf32, #tpu.memory_space<vmem>>, %arg6: memref<1x64xf32, #tpu.memory_space<vmem>>, %arg7: memref<512x64xbf16, #tpu.memory_space<vmem>>, %arg8: memref<512x64xf32, #tpu.memory_space<vmem>>) attributes {dimension_semantics = [#tpu.dimension_semantics<parallel>, #tpu.dimension_semantics<parallel>, #tpu.dimension_semantics<arbitrary>], iteration_bounds = array<i64: 1, 1, 1>, scalar_prefetch = 0 : i64, scratch_operands = 1 : i64, tpu.core_type = #tpu.core_type<tc>, window_params = [{transform_indices = @transform_0, window_bounds = array<i64: 512, 147>}, {transform_indices = @transform_1, window_bounds = array<i64: 147, 64>}, {transform_indices = @transform_2, window_bounds = array<i64: 1, 64>}, {transform_indices = @transform_3, window_bounds = array<i64: 1, 64>}, {transform_indices = @transform_4, window_bounds = array<i64: 512, 64>}]} {
    %c0_i32 = arith.constant 0 : i32
    %0 = arith.cmpi eq, %arg2, %c0_i32 : i32
    %1 = arith.extui %0 : i1 to i32
    %c0_i32_0 = arith.constant 0 : i32
    %2 = arith.cmpi ne, %1, %c0_i32_0 : i32
    scf.if %2 {
      %cst_10 = arith.constant 0.000000e+00 : f32
      %12 = vector.broadcast %cst_10 : f32 to vector<512x64xf32>
      %c0_11 = arith.constant 0 : index
      %c0_12 = arith.constant 0 : index
      %13 = vector.load %arg8[%c0_11, %c0_12] : memref<512x64xf32, #tpu.memory_space<vmem>>, vector<512x64xf32>
      tpu.vector_store %arg8[%c0_11, %c0_12], %12 {strides = array<i32>} : memref<512x64xf32, #tpu.memory_space<vmem>>, vector<512x64xf32>,
    } else {
    }
    %c0 = arith.constant 0 : index
    %c0_1 = arith.constant 0 : index
    %3 = vector.load %arg8[%c0, %c0_1] : memref<512x64xf32, #tpu.memory_space<vmem>>, vector<512x64xf32>
    %c0_2 = arith.constant 0 : index
    %c0_3 = arith.constant 0 : index
    %4 = vector.load %arg3[%c0_2, %c0_3] : memref<512x147xbf16, #tpu.memory_space<vmem>>, vector<512x147xbf16>
    %c0_4 = arith.constant 0 : index
    %c0_5 = arith.constant 0 : index
    %5 = vector.load %arg4[%c0_4, %c0_5] : memref<147x64xbf16, #tpu.memory_space<vmem>>, vector<147x64xbf16>
    %cst = arith.constant dense<0.000000e+00> : vector<512x64xf32>
    %6 = tpu.matmul %4, %5, %cst {dimension_numbers = #tpu.dot_dimension_numbers<[1], [0], [0], [1], [0, 0, 1, 1], [], []>} : vector<512x147xbf16>, vector<147x64xbf16>, vector<512x64xf32> -> vector<512x64xf32>
    %7 = arith.addf %3, %6 : vector<512x64xf32>
    %c0_6 = arith.constant 0 : index
    %c0_7 = arith.constant 0 : index
    %8 = vector.load %arg8[%c0_6, %c0_7] : memref<512x64xf32, #tpu.memory_space<vmem>>, vector<512x64xf32>
    tpu.vector_store %arg8[%c0_6, %c0_7], %7 {strides = array<i32>} : memref<512x64xf32, #tpu.memory_space<vmem>>, vector<512x64xf32>,
    %c0_i32_8 = arith.constant 0 : i32
    %9 = arith.cmpi eq, %arg2, %c0_i32_8 : i32
    %10 = arith.extui %9 : i1 to i32
    %c0_i32_9 = arith.constant 0 : i32
    %11 = arith.cmpi ne, %10, %c0_i32_9 : i32
    scf.if %11 {
      %c0_10 = arith.constant 0 : index
      %c0_11 = arith.constant 0 : index
      %12 = vector.load %arg8[%c0_10, %c0_11] : memref<512x64xf32, #tpu.memory_space<vmem>>, vector<512x64xf32>
      %c0_12 = arith.constant 0 : index
      %c0_13 = arith.constant 0 : index
      %13 = vector.load %arg5[%c0_12, %c0_13] : memref<1x64xf32, #tpu.memory_space<vmem>>, vector<1x64xf32>
      %14 = vector.broadcast %13 : vector<1x64xf32> to vector<512x64xf32>
      %15 = arith.mulf %12, %14 : vector<512x64xf32>
      %c0_14 = arith.constant 0 : index
      %c0_15 = arith.constant 0 : index
      %16 = vector.load %arg6[%c0_14, %c0_15] : memref<1x64xf32, #tpu.memory_space<vmem>>, vector<1x64xf32>
      %17 = vector.broadcast %16 : vector<1x64xf32> to vector<512x64xf32>
      %18 = arith.addf %15, %17 : vector<512x64xf32>
      %cst_16 = arith.constant 0.000000e+00 : f32
      %19 = vector.broadcast %cst_16 : f32 to vector<512x64xf32>
      %20 = arith.maximumf %18, %19 : vector<512x64xf32>
      %21 = arith.truncf %20 : vector<512x64xf32> to vector<512x64xbf16>
      %c0_17 = arith.constant 0 : index
      %c0_18 = arith.constant 0 : index
      %22 = vector.load %arg7[%c0_17, %c0_18] : memref<512x64xbf16, #tpu.memory_space<vmem>>, vector<512x64xbf16>
      tpu.vector_store %arg7[%c0_17, %c0_18], %21 {strides = array<i32>} : memref<512x64xbf16, #tpu.memory_space<vmem>>, vector<512x64xbf16>,
    } else {
    }
    return
  }
  func.func @transform_0(%arg0: i32, %arg1: i32, %arg2: i32) -> (i32, i32) {
    %c0_i32 = arith.constant 0 : i32
    return %arg0, %arg2 : i32, i32
  }
  func.func @transform_1(%arg0: i32, %arg1: i32, %arg2: i32) -> (i32, i32) {
    %c0_i32 = arith.constant 0 : i32
    return %arg2, %arg1 : i32, i32
  }
  func.func @transform_2(%arg0: i32, %arg1: i32, %arg2: i32) -> (i32, i32) {
    %c0_i32 = arith.constant 0 : i32
    %c0_i32_0 = arith.constant 0 : i32
    return %c0_i32, %arg1 : i32, i32
  }
  func.func @transform_3(%arg0: i32, %arg1: i32, %arg2: i32) -> (i32, i32) {
    %c0_i32 = arith.constant 0 : i32
    %c0_i32_0 = arith.constant 0 : i32
    return %c0_i32, %arg1 : i32, i32
  }
  func.func @transform_4(%arg0: i32, %arg1: i32, %arg2: i32) -> (i32, i32) {
    %c0_i32 = arith.constant 0 : i32
    return %arg0, %arg1 : i32, i32
  }
}

</mosaic_0001>

<bundles_post_ra>
// kernel: _lambda_.1
= control target key start
LH: loop header
LB: loop body
LE: loop exit
PB: predicated region body
PF: predicated region fallthrough
CT: control target
= control target key end

     0   :  { %v2106_v1 = vmov 0   ;;  %vm580_vm0 = vcmask 154624   ;;  %vm677_vm1 = vcmask 1040384   ;;  %vm678_vm2 = vcmask 1041408   ;;  %s2811_s0 = inlined_call_operand.vmem [shape: bf16[512,147], index: 0, kind: input, shape index: {}]   ;;  %s2812_s1 = inlined_call_operand.vmem [shape: bf16[147,64], index: 1, kind: input, shape index: {}]   ;;  %s2813_s2 = inlined_call_operand.vmem [shape: f32[1,64], index: 2, kind: input, shape index: {}]   ;;  %s2814_s3 = inlined_call_operand.vmem [shape: f32[1,64], index: 3, kind: input, shape index: {}]   ;;  %s2815_s4 = inlined_call_operand.hbm [shape: bf16[512,64], index: 4, kind: output, shape index: {}]  }
   0x1   :  { %v1974_v0 = vld [vmem:[%s2812_s1] sm:$0xff]   ;;  %684 = vmatprep.subr.bf16.mxu0 %v2106_v1  ;;  %1948 = vmatprep.subr.bf16.mxu1 %v2106_v1  ;;  %v1975_v2 = vld [vmem:[%s2812_s1 + $0x8] sm:$0xff]   ;;  %v1976_v3 = vld [vmem:[%s2812_s1 + $0x10] sm:$0xff]   ;;  %v2107_v11 = vmov 65535   ;;  %vm23_vm3 = vcmask 523264   ;;  %v2108_v17 = vmov 0.0  }
   0x2   :  { %685 = vmatpush1.bf16.msra.mxu0 %v1974_v0  ;;  %1958 = vmatpush1.bf16.msra.mxu1 %v1974_v0  ;;  %v1977_v4 = vld [vmem:[%s2812_s1 + $0x18] sm:$0xff]   ;;  %v1986_v5 = vld [vmem:[%s2811_s0 + $0x4] ss:$8 sps:$4 sm:$0xff]   ;;  %v1980_v9 = vld [vmem:[%s2812_s1 + $0x30] sm:$0xff]   ;;  %v679_v12 = vsel %vm677_vm1, 4294967295, %v2107_v11  ;;  %24 = vst.msk [vmem:[#allocation2] sm:$0xff] %vm23_vm3, %v2108_v17 }
   0x3   :  { %686 = vmatprep.subr.bf16.mxu0 %v2106_v1  ;;  %1949 = vmatprep.subr.bf16.mxu1 %v2106_v1  ;;  %v1989_v6 = vld [vmem:[%s2811_s0 + $0x104] ss:$8 sps:$4 sm:$0xff]   ;;  %v1981_v10 = vld [vmem:[%s2812_s1 + $0x38] sm:$0xff]   ;;  %v1983_v14 = vld [vmem:[%s2812_s1 + $0x48] ss:$0 sps:$4 sm:$0x33]  }
   0x4   :  { %1786 = vmatprep.mubr.msk.bf16.mxu0 %vm580_vm0, %v1986_v5  ;;  %v1978_v7 = vld [vmem:[%s2812_s1 + $0x20] sm:$0xff]   ;;  %1802 = vmatprep.mubr.msk.bf16.mxu1 %vm580_vm0, %v1989_v6  ;;  %v1979_v8 = vld [vmem:[%s2812_s1 + $0x28] sm:$0xff]   ;;  %v680_v15 = vsel %vm678_vm2, %v679_v12, 0  ;;  %25 = vst.msk [vmem:[#allocation2 + $0x8] sm:$0xff] %vm23_vm3, %v2108_v17  ;;  %26 = vst.msk [vmem:[#allocation2 + $0x10] sm:$0xff] %vm23_vm3, %v2108_v17 }
   0x5   :  { %v1982_v13 = vld [vmem:[%s2812_s1 + $0x40] sm:$0xff]   ;;  %v2175_v16 = vand.u32 %v1983_v14, %v680_v15  ;;  %27 = vst.msk [vmem:[#allocation2 + $0x18] sm:$0xff] %vm23_vm3, %v2108_v17  ;;  %28 = vst.msk [vmem:[#allocation2 + $0x20] sm:$0xff] %vm23_vm3, %v2108_v17  ;;  %v1990_v20 = vld [vmem:[%s2811_s0 + $0x14] ss:$8 sps:$4 sm:$0xff]  }
   0x6   :  { %687 = vmatpush1.bf16.msra.mxu0 %v1975_v2  ;;  %1959 = vmatpush1.bf16.msra.mxu1 %v1975_v2  ;;  %29 = vst.msk [vmem:[#allocation2 + $0x28] sm:$0xff] %vm23_vm3, %v2108_v17  ;;  %30 = vst.msk [vmem:[#allocation2 + $0x30] sm:$0xff] %vm23_vm3, %v2108_v17  ;;  %v1984_v18 = vld [vmem:[%s2811_s0] ss:$8 sps:$4 sm:$0xff]   ;;  %v1992_v21 = vld [vmem:[%s2811_s0 + $0x114] ss:$8 sps:$4 sm:$0xff]  }
   0x7   :  { %688 = vmatprep.subr.bf16.mxu0 %v2106_v1  ;;  %1950 = vmatprep.subr.bf16.mxu1 %v2106_v1  ;;  %31 = vst.msk [vmem:[#allocation2 + $0x38] sm:$0xff] %vm23_vm3, %v2108_v17  ;;  %32 = vst.msk [vmem:[#allocation2 + $0x40] sm:$0xff] %vm23_vm3, %v2108_v17  ;;  %v1987_v19 = vld [vmem:[%s2811_s0 + $0x100] ss:$8 sps:$4 sm:$0xff]   ;;  %v1994_v22 = vld [vmem:[%s2811_s0 + $0x10] ss:$8 sps:$4 sm:$0xff]  }
   0x8   :  { %33 = vst.msk [vmem:[#allocation2 + $0x48] sm:$0xff] %vm23_vm3, %v2108_v17  ;;  %34 = vst.msk [vmem:[#allocation2 + $0x50] sm:$0xff] %vm23_vm3, %v2108_v17  ;;  %v1995_v23 = vld [vmem:[%s2811_s0 + $0x110] ss:$8 sps:$4 sm:$0xff]   ;;  %v1996_v24 = vld [vmem:[%s2811_s0 + $0x24] ss:$8 sps:$4 sm:$0xff]  }
   0x9   :  { %35 = vst.msk [vmem:[#allocation2 + $0x58] sm:$0xff] %vm23_vm3, %v2108_v17  ;;  %36 = vst.msk [vmem:[#allocation2 + $0x60] sm:$0xff] %vm23_vm3, %v2108_v17  ;;  %v1998_v25 = vld [vmem:[%s2811_s0 + $0x124] ss:$8 sps:$4 sm:$0xff]  }
   0xa   :  { %689 = vmatpush1.bf16.msra.mxu0 %v1976_v3  ;;  %1960 = vmatpush1.bf16.msra.mxu1 %v1976_v3  ;;  %37 = vst.msk [vmem:[#allocation2 + $0x68] sm:$0xff] %vm23_vm3, %v2108_v17  ;;  %38 = vst.msk [vmem:[#allocation2 + $0x70] sm:$0xff] %vm23_vm3, %v2108_v17 }
   0xb   :  { %690 = vmatprep.subr.bf16.mxu0 %v2106_v1  ;;  %1951 = vmatprep.subr.bf16.mxu1 %v2106_v1  ;;  %39 = vst.msk [vmem:[#allocation2 + $0x78] sm:$0xff] %vm23_vm3, %v2108_v17  ;;  %40 = vst.msk [vmem:[#allocation2 + $0x80] sm:$0xff] %vm23_vm3, %v2108_v17 }
   0xc   :  { %41 = vst.msk [vmem:[#allocation2 + $0x88] sm:$0xff] %vm23_vm3, %v2108_v17  ;;  %42 = vst.msk [vmem:[#allocation2 + $0x90] sm:$0xff] %vm23_vm3, %v2108_v17 }
   0xd   :  { %43 = vst.msk [vmem:[#allocation2 + $0x98] sm:$0xff] %vm23_vm3, %v2108_v17  ;;  %44 = vst.msk [vmem:[#allocation2 + $0xa0] sm:$0xff] %vm23_vm3, %v2108_v17 }
   0xe   :  { %691 = vmatpush1.bf16.msra.mxu0 %v1977_v4  ;;  %1961 = vmatpush1.bf16.msra.mxu1 %v1977_v4  ;;  %45 = vst.msk [vmem:[#allocation2 + $0xa8] sm:$0xff] %vm23_vm3, %v2108_v17  ;;  %46 = vst.msk [vmem:[#allocation2 + $0xb0] sm:$0xff] %vm23_vm3, %v2108_v17 }
   0xf   :  { %692 = vmatprep.subr.bf16.mxu0 %v2106_v1  ;;  %1952 = vmatprep.subr.bf16.mxu1 %v2106_v1  ;;  %47 = vst.msk [vmem:[#allocation2 + $0xb8] sm:$0xff] %vm23_vm3, %v2108_v17  ;;  %48 = vst.msk [vmem:[#allocation2 + $0xc0] sm:$0xff] %vm23_vm3, %v2108_v17 }
  0x10   :  { %49 = vst.msk [vmem:[#allocation2 + $0xc8] sm:$0xff] %vm23_vm3, %v2108_v17  ;;  %50 = vst.msk [vmem:[#allocation2 + $0xd0] sm:$0xff] %vm23_vm3, %v2108_v17 }
  0x11   :  { %51 = vst.msk [vmem:[#allocation2 + $0xd8] sm:$0xff] %vm23_vm3, %v2108_v17  ;;  %52 = vst.msk [vmem:[#allocation2 + $0xe0] sm:$0xff] %vm23_vm3, %v2108_v17 }
  0x12   :  { %693 = vmatpush1.bf16.msra.mxu0 %v1978_v7  ;;  %1962 = vmatpush1.bf16.msra.mxu1 %v1978_v7  ;;  %53 = vst.msk [vmem:[#allocation2 + $0xe8] sm:$0xff] %vm23_vm3, %v2108_v17  ;;  %54 = vst.msk [vmem:[#allocation2 + $0xf0] sm:$0xff] %vm23_vm3, %v2108_v17 }
  0x13   :  { %694 = vmatprep.subr.bf16.mxu0 %v2106_v1  ;;  %1953 = vmatprep.subr.bf16.mxu1 %v2106_v1  ;;  %55 = vst.msk [vmem:[#allocation2 + $0xf8] sm:$0xff] %vm23_vm3, %v2108_v17  ;;  %56 = vst.msk [vmem:[#allocation2 + $0x100] sm:$0xff] %vm23_vm3, %v2108_v17 }
  0x14   :  { %57 = vst.msk [vmem:[#allocation2 + $0x108] sm:$0xff] %vm23_vm3, %v2108_v17  ;;  %58 = vst.msk [vmem:[#allocation2 + $0x110] sm:$0xff] %vm23_vm3, %v2108_v17 }
  0x15   :  { %59 = vst.msk [vmem:[#allocation2 + $0x118] sm:$0xff] %vm23_vm3, %v2108_v17  ;;  %60 = vst.msk [vmem:[#allocation2 + $0x120] sm:$0xff] %vm23_vm3, %v2108_v17 }
  0x16   :  { %695 = vmatpush1.bf16.msra.mxu0 %v1979_v8  ;;  %1963 = vmatpush1.bf16.msra.mxu1 %v1979_v8  ;;  %61 = vst.msk [vmem:[#allocation2 + $0x128] sm:$0xff] %vm23_vm3, %v2108_v17  ;;  %62 = vst.msk [vmem:[#allocation2 + $0x130] sm:$0xff] %vm23_vm3, %v2108_v17 }
  0x17   :  { %696 = vmatprep.subr.bf16.mxu0 %v2106_v1  ;;  %1954 = vmatprep.subr.bf16.mxu1 %v2106_v1  ;;  %63 = vst.msk [vmem:[#allocation2 + $0x138] sm:$0xff] %vm23_vm3, %v2108_v17  ;;  %64 = vst.msk [vmem:[#allocation2 + $0x140] sm:$0xff] %vm23_vm3, %v2108_v17 }
  0x18   :  { %65 = vst.msk [vmem:[#allocation2 + $0x148] sm:$0xff] %vm23_vm3, %v2108_v17  ;;  %66 = vst.msk [vmem:[#allocation2 + $0x150] sm:$0xff] %vm23_vm3, %v2108_v17 }
  0x19   :  { %67 = vst.msk [vmem:[#allocation2 + $0x158] sm:$0xff] %vm23_vm3, %v2108_v17  ;;  %68 = vst.msk [vmem:[#allocation2 + $0x160] sm:$0xff] %vm23_vm3, %v2108_v17 }
  0x1a   :  { %697 = vmatpush1.bf16.msra.mxu0 %v1980_v9  ;;  %1964 = vmatpush1.bf16.msra.mxu1 %v1980_v9  ;;  %69 = vst.msk [vmem:[#allocation2 + $0x168] sm:$0xff] %vm23_vm3, %v2108_v17  ;;  %70 = vst.msk [vmem:[#allocation2 + $0x170] sm:$0xff] %vm23_vm3, %v2108_v17 }
  0x1b   :  { %698 = vmatprep.subr.bf16.mxu0 %v2106_v1  ;;  %1955 = vmatprep.subr.bf16.mxu1 %v2106_v1  ;;  %71 = vst.msk [vmem:[#allocation2 + $0x178] sm:$0xff] %vm23_vm3, %v2108_v17  ;;  %72 = vst.msk [vmem:[#allocation2 + $0x180] sm:$0xff] %vm23_vm3, %v2108_v17 }
  0x1c   :  { %73 = vst.msk [vmem:[#allocation2 + $0x188] sm:$0xff] %vm23_vm3, %v2108_v17  ;;  %74 = vst.msk [vmem:[#allocation2 + $0x190] sm:$0xff] %vm23_vm3, %v2108_v17 }
  0x1d   :  { %75 = vst.msk [vmem:[#allocation2 + $0x198] sm:$0xff] %vm23_vm3, %v2108_v17  ;;  %76 = vst.msk [vmem:[#allocation2 + $0x1a0] sm:$0xff] %vm23_vm3, %v2108_v17 }
  0x1e   :  { %699 = vmatpush1.bf16.msra.mxu0 %v1981_v10  ;;  %1965 = vmatpush1.bf16.msra.mxu1 %v1981_v10  ;;  %77 = vst.msk [vmem:[#allocation2 + $0x1a8] sm:$0xff] %vm23_vm3, %v2108_v17  ;;  %78 = vst.msk [vmem:[#allocation2 + $0x1b0] sm:$0xff] %vm23_vm3, %v2108_v17 }
  0x1f   :  { %700 = vmatprep.subr.bf16.mxu0 %v2106_v1  ;;  %1956 = vmatprep.subr.bf16.mxu1 %v2106_v1  ;;  %79 = vst.msk [vmem:[#allocation2 + $0x1b8] sm:$0xff] %vm23_vm3, %v2108_v17  ;;  %80 = vst.msk [vmem:[#allocation2 + $0x1c0] sm:$0xff] %vm23_vm3, %v2108_v17 }
  0x20   :  { %81 = vst.msk [vmem:[#allocation2 + $0x1c8] sm:$0xff] %vm23_vm3, %v2108_v17  ;;  %82 = vst.msk [vmem:[#allocation2 + $0x1d0] sm:$0xff] %vm23_vm3, %v2108_v17 }
  0x21   :  { %83 = vst.msk [vmem:[#allocation2 + $0x1d8] sm:$0xff] %vm23_vm3, %v2108_v17  ;;  %84 = vst.msk [vmem:[#allocation2 + $0x1e0] sm:$0xff] %vm23_vm3, %v2108_v17 }
  0x22   :  { %701 = vmatpush1.bf16.msra.mxu0 %v1982_v13  ;;  %1966 = vmatpush1.bf16.msra.mxu1 %v1982_v13  ;;  %85 = vst.msk [vmem:[#allocation2 + $0x1e8] sm:$0xff] %vm23_vm3, %v2108_v17  ;;  %86 = vst.msk [vmem:[#allocation2 + $0x1f0] sm:$0xff] %vm23_vm3, %v2108_v17 }
  0x23   :  { %702 = vmatprep.subr.bf16.mxu0 %v2106_v1  ;;  %1957 = vmatprep.subr.bf16.mxu1 %v2106_v1  ;;  %87 = vst.msk [vmem:[#allocation2 + $0x1f8] sm:$0xff] %vm23_vm3, %v2108_v17 }
  0x26   :  { %703 = vmatpush1.bf16.msra.mxu0 %v2175_v16  ;;  %1967 = vmatpush1.bf16.msra.mxu1 %v2175_v16 }
  0x29   :  { %717 = vmatmul.mubr.bf16.vlgmr.msra.gmra.mrb[0].mxu0 %v1984_v18  ;;  %845 = vmatmul.mubr.bf16.vlgmr.msra.gmra.mrb[0].mxu1 %v1987_v19 }
  0x2a   :  { %1787 = vmatprep.mubr.msk.bf16.mxu0 %vm580_vm0, %v1990_v20  ;;  %1803 = vmatprep.mubr.msk.bf16.mxu1 %vm580_vm0, %v1992_v21 }
  0x31   :  { %725 = vmatmul.mubr.bf16.gmra.mrb[4].mxu0 %v1994_v22  ;;  %853 = vmatmul.mubr.bf16.gmra.mrb[4].mxu1 %v1995_v23 }
  0x32   :  { %1788 = vmatprep.mubr.msk.bf16.mxu0 %vm580_vm0, %v1996_v24  ;;  %1804 = vmatprep.mubr.msk.bf16.mxu1 %vm580_vm0, %v1998_v25 }
  0x33   :  { %9 = vsyncpa [#allocation4], 0  ;;  %v2000_v26 = vld [vmem:[%s2811_s0 + $0x20] ss:$8 sps:$4 sm:$0xff]   ;;  %v2002_v28 = vld [vmem:[%s2811_s0 + $0x34] ss:$8 sps:$4 sm:$0xff]  }
  0x34   :  { %v2001_v27 = vld [vmem:[%s2811_s0 + $0x120] ss:$8 sps:$4 sm:$0xff]   ;;  %v2004_v29 = vld [vmem:[%s2811_s0 + $0x134] ss:$8 sps:$4 sm:$0xff]   ;;  %v2006_v30 = vld [vmem:[%s2811_s0 + $0x30] ss:$8 sps:$4 sm:$0xff]  }
  0x35   :  { %v2007_v31 = vld [vmem:[%s2811_s0 + $0x130] ss:$8 sps:$4 sm:$0xff]   ;;  %v2008_v32 = vld [vmem:[%s2811_s0 + $0x44] ss:$8 sps:$4 sm:$0xff]   ;;  %v2012_v34 = vld [vmem:[%s2811_s0 + $0x40] ss:$8 sps:$4 sm:$0xff]  }
  0x36   :  { %v2010_v33 = vld [vmem:[%s2811_s0 + $0x144] ss:$8 sps:$4 sm:$0xff]   ;;  %v2013_v35 = vld [vmem:[%s2811_s0 + $0x140] ss:$8 sps:$4 sm:$0xff]   ;;  %v2014_v36 = vld [vmem:[%s2811_s0 + $0x54] ss:$8 sps:$4 sm:$0xff]  }
  0x37   :  { %v2016_v37 = vld [vmem:[%s2811_s0 + $0x154] ss:$8 sps:$4 sm:$0xff]   ;;  %v2018_v38 = vld [vmem:[%s2811_s0 + $0x50] ss:$8 sps:$4 sm:$0xff]   ;;  %v2020_v40 = vld [vmem:[%s2811_s0 + $0x64] ss:$8 sps:$4 sm:$0xff]  }
  0x38   :  { %v2019_v39 = vld [vmem:[%s2811_s0 + $0x150] ss:$8 sps:$4 sm:$0xff]   ;;  %v2022_v41 = vld [vmem:[%s2811_s0 + $0x164] ss:$8 sps:$4 sm:$0xff]   ;;  %v2024_v42 = vld [vmem:[%s2811_s0 + $0x60] ss:$8 sps:$4 sm:$0xff]  }
  0x39   :  { %733 = vmatmul.mubr.bf16.gmra.mrb[8].mxu0 %v2000_v26  ;;  %861 = vmatmul.mubr.bf16.gmra.mrb[8].mxu1 %v2001_v27  ;;  %v2025_v43 = vld [vmem:[%s2811_s0 + $0x160] ss:$8 sps:$4 sm:$0xff]   ;;  %v2026_v44 = vld [vmem:[%s2811_s0 + $0x74] ss:$8 sps:$4 sm:$0xff]   ;;  %v2030_v46 = vld [vmem:[%s2811_s0 + $0x70] ss:$8 sps:$4 sm:$0xff]  }
  0x3a   :  { %1789 = vmatprep.mubr.msk.bf16.mxu0 %vm580_vm0, %v2002_v28  ;;  %1805 = vmatprep.mubr.msk.bf16.mxu1 %vm580_vm0, %v2004_v29  ;;  %v2028_v45 = vld [vmem:[%s2811_s0 + $0x174] ss:$8 sps:$4 sm:$0xff]   ;;  %v2031_v47 = vld [vmem:[%s2811_s0 + $0x170] ss:$8 sps:$4 sm:$0xff]   ;;  %v2032_v48 = vld [vmem:[%s2811_s0 + $0x84] ss:$8 sps:$4 sm:$0xff]  }
  0x3b   :  { %v2034_v49 = vld [vmem:[%s2811_s0 + $0x184] ss:$8 sps:$4 sm:$0xff]   ;;  %v2036_v50 = vld [vmem:[%s2811_s0 + $0x80] ss:$8 sps:$4 sm:$0xff]   ;;  %v2038_v52 = vld [vmem:[%s2811_s0 + $0x94] ss:$8 sps:$4 sm:$0xff]  }
  0x3c   :  { %v2037_v51 = vld [vmem:[%s2811_s0 + $0x180] ss:$8 sps:$4 sm:$0xff]   ;;  %v2040_v53 = vld [vmem:[%s2811_s0 + $0x194] ss:$8 sps:$4 sm:$0xff]   ;;  %v2042_v54 = vld [vmem:[%s2811_s0 + $0x90] ss:$8 sps:$4 sm:$0xff]  }
  0x3d   :  { %v2043_v55 = vld [vmem:[%s2811_s0 + $0x190] ss:$8 sps:$4 sm:$0xff]   ;;  %v2044_v56 = vld [vmem:[%s2811_s0 + $0xa4] ss:$8 sps:$4 sm:$0xff]   ;;  %v2048_v58 = vld [vmem:[%s2811_s0 + $0xa0] ss:$8 sps:$4 sm:$0xff]  }
  0x3e   :  { %v2046_v57 = vld [vmem:[%s2811_s0 + $0x1a4] ss:$8 sps:$4 sm:$0xff]   ;;  %v2049_v59 = vld [vmem:[%s2811_s0 + $0x1a0] ss:$8 sps:$4 sm:$0xff]   ;;  %v2050_v60 = vld [vmem:[%s2811_s0 + $0xb4] ss:$8 sps:$4 sm:$0xff]  }
  0x3f   :  { %v2052_v61 = vld [vmem:[%s2811_s0 + $0x1b4] ss:$8 sps:$4 sm:$0xff]   ;;  %v2054_v62 = vld [vmem:[%s2811_s0 + $0xb0] ss:$8 sps:$4 sm:$0xff]   ;;  %v2056_v0 = vld [vmem:[%s2811_s0 + $0xc4] ss:$8 sps:$4 sm:$0xff]  }
  0x40   :  { %v2055_v63 = vld [vmem:[%s2811_s0 + $0x1b0] ss:$8 sps:$4 sm:$0xff]   ;;  %v2058_v1 = vld [vmem:[%s2811_s0 + $0x1c4] ss:$8 sps:$4 sm:$0xff]   ;;  %v2060_v2 = vld [vmem:[%s2811_s0 + $0xc0] ss:$8 sps:$4 sm:$0xff]  }
  0x41   :  { %741 = vmatmul.mubr.bf16.gmra.mrb[12].mxu0 %v2006_v30  ;;  %869 = vmatmul.mubr.bf16.gmra.mrb[12].mxu1 %v2007_v31  ;;  %v2061_v3 = vld [vmem:[%s2811_s0 + $0x1c0] ss:$8 sps:$4 sm:$0xff]   ;;  %v2062_v4 = vld [vmem:[%s2811_s0 + $0xd4] ss:$8 sps:$4 sm:$0xff]   ;;  %v2066_v6 = vld [vmem:[%s2811_s0 + $0xd0] ss:$8 sps:$4 sm:$0xff]  }
  0x42   :  { %1790 = vmatprep.mubr.msk.bf16.mxu0 %vm580_vm0, %v2008_v32  ;;  %1806 = vmatprep.mubr.msk.bf16.mxu1 %vm580_vm0, %v2010_v33  ;;  %v2064_v5 = vld [vmem:[%s2811_s0 + $0x1d4] ss:$8 sps:$4 sm:$0xff]   ;;  %v2067_v7 = vld [vmem:[%s2811_s0 + $0x1d0] ss:$8 sps:$4 sm:$0xff]   ;;  %v2068_v8 = vld [vmem:[%s2811_s0 + $0xe4] ss:$8 sps:$4 sm:$0xff]  }
  0x43   :  { %v2070_v9 = vld [vmem:[%s2811_s0 + $0x1e4] ss:$8 sps:$4 sm:$0xff]   ;;  %v2072_v10 = vld [vmem:[%s2811_s0 + $0xe0] ss:$8 sps:$4 sm:$0xff]   ;;  %v2074_v12 = vld [vmem:[%s2811_s0 + $0xf4] ss:$8 sps:$4 sm:$0xff]  }
  0x44   :  { %v2073_v11 = vld [vmem:[%s2811_s0 + $0x1e0] ss:$8 sps:$4 sm:$0xff]   ;;  %v2076_v13 = vld [vmem:[%s2811_s0 + $0x1f4] ss:$8 sps:$4 sm:$0xff]   ;;  %v2078_v14 = vld [vmem:[%s2811_s0 + $0xf0] ss:$8 sps:$4 sm:$0xff]  }
  0x45   :  { %v2079_v15 = vld [vmem:[%s2811_s0 + $0x1f0] ss:$8 sps:$4 sm:$0xff]   ;;  %v88_v16 = vld [vmem:[#allocation2] sm:$0xff]  ;;  %v89_v20 = vld [vmem:[#allocation2 + $0x8] sm:$0xff]  ;;  %vm1631_vm4 = vcmask 519168  }
  0x46   :  { %v120_v17 = vld [vmem:[#allocation2 + $0x100] sm:$0xff]  ;;  %v121_v21 = vld [vmem:[#allocation2 + $0x108] sm:$0xff]  ;;  %v90_v32 = vld [vmem:[#allocation2 + $0x10] sm:$0xff] }
  0x47   :  { %v122_v33 = vld [vmem:[#allocation2 + $0x110] sm:$0xff] }
  0x49   :  { %749 = vmatmul.mubr.bf16.gmra.mrb[16].mxu0 %v2012_v34  ;;  %877 = vmatmul.mubr.bf16.gmra.mrb[16].mxu1 %v2013_v35  ;;  %v2530_v34 = vld [vmem:[%s2813_s2] ss:$0 sm:$0xff] }
  0x4a   :  { %1791 = vmatprep.mubr.msk.bf16.mxu0 %vm580_vm0, %v2014_v36  ;;  %1807 = vmatprep.mubr.msk.bf16.mxu1 %vm580_vm0, %v2016_v37  ;;  %v91_v37 = vld [vmem:[#allocation2 + $0x18] sm:$0xff] }
  0x51   :  { %757 = vmatmul.mubr.bf16.gmra.mrb[20].mxu0 %v2018_v38  ;;  %885 = vmatmul.mubr.bf16.gmra.mrb[20].mxu1 %v2019_v39  ;;  %v123_v38 = vld [vmem:[#allocation2 + $0x118] sm:$0xff] }
  0x52   :  { %1792 = vmatprep.mubr.msk.bf16.mxu0 %vm580_vm0, %v2020_v40  ;;  %1808 = vmatprep.mubr.msk.bf16.mxu1 %vm580_vm0, %v2022_v41 }
  0x59   :  { %765 = vmatmul.mubr.bf16.gmra.mrb[24].mxu0 %v2024_v42  ;;  %893 = vmatmul.mubr.bf16.gmra.mrb[24].mxu1 %v2025_v43 }
  0x5a   :  { %1793 = vmatprep.mubr.msk.bf16.mxu0 %vm580_vm0, %v2026_v44  ;;  %1809 = vmatprep.mubr.msk.bf16.mxu1 %vm580_vm0, %v2028_v45  ;;  %v2535_v44 = vld [vmem:[%s2814_s3] ss:$0 sm:$0xff] }
  0x61   :  { %773 = vmatmul.mubr.bf16.gmra.mrb[28].mxu0 %v2030_v46  ;;  %901 = vmatmul.mubr.bf16.gmra.mrb[28].mxu1 %v2031_v47 }
  0x62   :  { %1794 = vmatprep.mubr.msk.bf16.mxu0 %vm580_vm0, %v2032_v48  ;;  %1810 = vmatprep.mubr.msk.bf16.mxu1 %vm580_vm0, %v2034_v49 }
  0x69   :  { %781 = vmatmul.mubr.bf16.gmra.mrb[32].mxu0 %v2036_v50  ;;  %909 = vmatmul.mubr.bf16.gmra.mrb[32].mxu1 %v2037_v51 }
  0x6a   :  { %1795 = vmatprep.mubr.msk.bf16.mxu0 %vm580_vm0, %v2038_v52  ;;  %1811 = vmatprep.mubr.msk.bf16.mxu1 %vm580_vm0, %v2040_v53 }
  0x71   :  { %789 = vmatmul.mubr.bf16.gmra.mrb[36].mxu0 %v2042_v54  ;;  %917 = vmatmul.mubr.bf16.gmra.mrb[36].mxu1 %v2043_v55 }
  0x72   :  { %1796 = vmatprep.mubr.msk.bf16.mxu0 %vm580_vm0, %v2044_v56  ;;  %1812 = vmatprep.mubr.msk.bf16.mxu1 %vm580_vm0, %v2046_v57 }
  0x79   :  { %797 = vmatmul.mubr.bf16.gmra.mrb[40].mxu0 %v2048_v58  ;;  %925 = vmatmul.mubr.bf16.gmra.mrb[40].mxu1 %v2049_v59 }
  0x7a   :  { %1797 = vmatprep.mubr.msk.bf16.mxu0 %vm580_vm0, %v2050_v60  ;;  %1813 = vmatprep.mubr.msk.bf16.mxu1 %vm580_vm0, %v2052_v61 }
  0x81   :  { %805 = vmatmul.mubr.bf16.gmra.mrb[44].mxu0 %v2054_v62  ;;  %933 = vmatmul.mubr.bf16.gmra.mrb[44].mxu1 %v2055_v63 }
  0x82   :  { %1798 = vmatprep.mubr.msk.bf16.mxu0 %vm580_vm0, %v2056_v0  ;;  %1814 = vmatprep.mubr.msk.bf16.mxu1 %vm580_vm0, %v2058_v1  ;;  %v92_v0 = vld [vmem:[#allocation2 + $0x20] sm:$0xff] }
  0x83   :  { %v124_v1 = vld [vmem:[#allocation2 + $0x120] sm:$0xff] }
  0x89   :  { %813 = vmatmul.mubr.bf16.gmra.mrb[48].mxu0 %v2060_v2  ;;  %941 = vmatmul.mubr.bf16.gmra.mrb[48].mxu1 %v2061_v3 }
  0x8a   :  { %1799 = vmatprep.mubr.msk.bf16.mxu0 %vm580_vm0, %v2062_v4  ;;  %1815 = vmatprep.mubr.msk.bf16.mxu1 %vm580_vm0, %v2064_v5 }
  0x91   :  { %821 = vmatmul.mubr.bf16.gmra.mrb[52].mxu0 %v2066_v6  ;;  %949 = vmatmul.mubr.bf16.gmra.mrb[52].mxu1 %v2067_v7 }
  0x92   :  { %1800 = vmatprep.mubr.msk.bf16.mxu0 %vm580_vm0, %v2068_v8  ;;  %1816 = vmatprep.mubr.msk.bf16.mxu1 %vm580_vm0, %v2070_v9 }
  0x99   :  { %829 = vmatmul.mubr.bf16.gmra.mrb[56].mxu0 %v2072_v10  ;;  %957 = vmatmul.mubr.bf16.gmra.mrb[56].mxu1 %v2073_v11  ;;  %v93_v10 = vld [vmem:[#allocation2 + $0x28] sm:$0xff] }
  0x9a   :  { %1801 = vmatprep.mubr.msk.bf16.mxu0 %vm580_vm0, %v2074_v12  ;;  %1817 = vmatprep.mubr.msk.bf16.mxu1 %vm580_vm0, %v2076_v13  ;;  %v125_v11 = vld [vmem:[#allocation2 + $0x128] sm:$0xff] }
  0xa1   :  { %837 = vmatmul.mubr.bf16.gmra.mrb[60].mxu0 %v2078_v14  ;;  %965 = vmatmul.mubr.bf16.gmra.mrb[60].mxu1 %v2079_v15 }
  0xfc   :  { %v718_v18 = vpop.f32.mrb[0].mxu0  ;;  %v846_v19 = vpop.f32.mrb[0].mxu1 }
  0xfd   :  { %v973_v22 = vadd.f32 %v718_v18, %v88_v16  ;;  %v1005_v23 = vadd.f32 %v846_v19, %v120_v17  ;;  %v720_v24 = vpop.f32.mrb[1].mxu0  ;;  %v848_v25 = vpop.f32.mrb[1].mxu1 }
  0xfe   :  { %v721_v26 = vpop.f32.mrb[2].mxu0  ;;  %v849_v27 = vpop.f32.mrb[2].mxu1 }
  0xff   :  { %1038 = vst.msk [vmem:[#allocation2] sm:$0xff] %vm23_vm3, %v973_v22  ;;  %1070 = vst.msk [vmem:[#allocation2 + $0x100] sm:$0xff] %vm23_vm3, %v1005_v23  ;;  %v974_v28 = vadd.f32 %v721_v26, %v89_v20  ;;  %v1006_v29 = vadd.f32 %v849_v27, %v121_v21  ;;  %v723_v30 = vpop.f32.mrb[3].mxu0  ;;  %v851_v31 = vpop.f32.mrb[3].mxu1 }
 0x101   :  { %1039 = vst.msk [vmem:[#allocation2 + $0x8] sm:$0xff] %vm23_vm3, %v974_v28  ;;  %1071 = vst.msk [vmem:[#allocation2 + $0x108] sm:$0xff] %vm23_vm3, %v1006_v29 }
 0x104   :  { %v726_v35 = vpop.f32.mrb[4].mxu0  ;;  %v854_v36 = vpop.f32.mrb[4].mxu1 }
 0x105   :  { %v975_v39 = vadd.f32 %v726_v35, %v90_v32  ;;  %v1007_v40 = vadd.f32 %v854_v36, %v122_v33  ;;  %v728_v41 = vpop.f32.mrb[5].mxu0  ;;  %v856_v42 = vpop.f32.mrb[5].mxu1 }
 0x106   :  { %v1105_v43 = vld [vmem:[#allocation2] sm:$0xff]  ;;  %v729_v46 = vpop.f32.mrb[6].mxu0  ;;  %v857_v47 = vpop.f32.mrb[6].mxu1  ;;  %v95_v41 = vld [vmem:[#allocation2 + $0x38] sm:$0xff] }
 0x107   :  { %v1137_v45 = vld [vmem:[#allocation2 + $0x100] sm:$0xff]  ;;  %v1176_v48 = vmul.f32 %v2530_v34, %v1105_v43  ;;  %1040 = vst.msk [vmem:[#allocation2 + $0x10] sm:$0xff] %vm23_vm3, %v975_v39  ;;  %1072 = vst.msk [vmem:[#allocation2 + $0x110] sm:$0xff] %vm23_vm3, %v1007_v40  ;;  %v976_v50 = vadd.f32 %v729_v46, %v91_v37  ;;  %v1008_v51 = vadd.f32 %v857_v47, %v123_v38  ;;  %v731_v52 = vpop.f32.mrb[7].mxu0  ;;  %v859_v53 = vpop.f32.mrb[7].mxu1  ;;  %v94_v37 = vld [vmem:[#allocation2 + $0x30] sm:$0xff] }
 0x108   :  { %v1208_v49 = vmul.f32 %v2530_v34, %v1137_v45  ;;  %v1106_v54 = vld [vmem:[#allocation2 + $0x8] sm:$0xff]  ;;  %v126_v38 = vld [vmem:[#allocation2 + $0x130] sm:$0xff]  ;;  %v127_v42 = vld [vmem:[#allocation2 + $0x138] sm:$0xff] }
 0x109   :  { %v1138_v55 = vld [vmem:[#allocation2 + $0x108] sm:$0xff]  ;;  %v1247_v56 = vadd.f32 %v2535_v44, %v1176_v48  ;;  %v1177_v58 = vmul.f32 %v2530_v34, %v1106_v54  ;;  %1041 = vst.msk [vmem:[#allocation2 + $0x18] sm:$0xff] %vm23_vm3, %v976_v50  ;;  %1073 = vst.msk [vmem:[#allocation2 + $0x118] sm:$0xff] %vm23_vm3, %v1008_v51 }
 0x10a   :  { %v1279_v57 = vadd.f32 %v2535_v44, %v1208_v49  ;;  %v1209_v59 = vmul.f32 %v2530_v34, %v1138_v55 }
 0x10b   :  { %v1311_v60 = vmax.f32 %v1247_v56, 0.0  ;;  %v1248_v62 = vadd.f32 %v2535_v44, %v1177_v58 }
 0x10c   :  { %v1343_v61 = vmax.f32 %v1279_v57, 0.0  ;;  %v1280_v63 = vadd.f32 %v2535_v44, %v1209_v59  ;;  %v734_v2 = vpop.f32.mrb[8].mxu0  ;;  %v862_v3 = vpop.f32.mrb[8].mxu1 }
 0x10d   :  { %v1884_v4 = vpack.c.bf16 %v1311_v60, %v1311_v60  ;;  %v1312_v6 = vmax.f32 %v1248_v62, 0.0  ;;  %v736_v8 = vpop.f32.mrb[9].mxu0  ;;  %v864_v9 = vpop.f32.mrb[9].mxu1  ;;  %v977_v14 = vadd.f32 %v734_v2, %v92_v0  ;;  %v1009_v15 = vadd.f32 %v862_v3, %v124_v1 }
 0x10e   :  { %v1916_v5 = vpack.c.bf16 %v1343_v61, %v1343_v61  ;;  %v1344_v7 = vmax.f32 %v1280_v63, 0.0  ;;  %v1107_v12 = vld [vmem:[#allocation2 + $0x10] sm:$0xff]  ;;  %v737_v16 = vpop.f32.mrb[10].mxu0  ;;  %v865_v17 = vpop.f32.mrb[10].mxu1 }
 0x10f   :  { %v1139_v13 = vld [vmem:[#allocation2 + $0x110] sm:$0xff]  ;;  %1632 = vst.msk [vmem:[#allocation3] sm:$0xf] %vm1631_vm4, %v1884_v4  ;;  %v1885_v18 = vpack.c.bf16 %v1312_v6, %v1312_v6  ;;  %v1178_v20 = vmul.f32 %v2530_v34, %v1107_v12  ;;  %v739_v22 = vpop.f32.mrb[11].mxu0  ;;  %v867_v23 = vpop.f32.mrb[11].mxu1  ;;  %v978_v26 = vadd.f32 %v737_v16, %v93_v10  ;;  %v1010_v27 = vadd.f32 %v865_v17, %v125_v11  ;;  %v96_v6 = vld [vmem:[#allocation2 + $0x40] sm:$0xff] }
 0x110   :  { %1664 = vst.msk [vmem:[#allocation3 + $0x80] sm:$0xf] %vm1631_vm4, %v1916_v5  ;;  %v1917_v19 = vpack.c.bf16 %v1344_v7, %v1344_v7  ;;  %v1210_v21 = vmul.f32 %v2530_v34, %v1139_v13  ;;  %v1108_v24 = vld [vmem:[#allocation2 + $0x18] sm:$0xff]  ;;  %v128_v7 = vld [vmem:[#allocation2 + $0x140] sm:$0xff] }
 0x111   :  { %v1140_v25 = vld [vmem:[#allocation2 + $0x118] sm:$0xff]  ;;  %1042 = vst.msk [vmem:[#allocation2 + $0x20] sm:$0xff] %vm23_vm3, %v977_v14  ;;  %1074 = vst.msk [vmem:[#allocation2 + $0x120] sm:$0xff] %vm23_vm3, %v1009_v15  ;;  %v1249_v28 = vadd.f32 %v2535_v44, %v1178_v20  ;;  %v1179_v30 = vmul.f32 %v2530_v34, %v1108_v24  ;;  %v97_v14 = vld [vmem:[#allocation2 + $0x48] sm:$0xff] }
 0x112   :  { %1633 = vst.msk [vmem:[#allocation3 + $0x4] sm:$0xf] %vm1631_vm4, %v1885_v18  ;;  %1665 = vst.msk [vmem:[#allocation3 + $0x84] sm:$0xf] %vm1631_vm4, %v1917_v19  ;;  %v1281_v29 = vadd.f32 %v2535_v44, %v1210_v21  ;;  %v1211_v31 = vmul.f32 %v2530_v34, %v1140_v25  ;;  %v129_v15 = vld [vmem:[#allocation2 + $0x148] sm:$0xff] }
 0x113   :  { %1043 = vst.msk [vmem:[#allocation2 + $0x28] sm:$0xff] %vm23_vm3, %v978_v26  ;;  %1075 = vst.msk [vmem:[#allocation2 + $0x128] sm:$0xff] %vm23_vm3, %v1010_v27  ;;  %v1313_v32 = vmax.f32 %v1249_v28, 0.0  ;;  %v1250_v35 = vadd.f32 %v2535_v44, %v1179_v30 }
 0x114   :  { %v1345_v33 = vmax.f32 %v1281_v29, 0.0  ;;  %v1282_v36 = vadd.f32 %v2535_v44, %v1211_v31  ;;  %v742_v39 = vpop.f32.mrb[12].mxu0  ;;  %v870_v40 = vpop.f32.mrb[12].mxu1 }
 0x115   :  { %v1886_v43 = vpack.c.bf16 %v1313_v32, %v1313_v32  ;;  %v1314_v46 = vmax.f32 %v1250_v35, 0.0  ;;  %v744_v48 = vpop.f32.mrb[13].mxu0  ;;  %v872_v49 = vpop.f32.mrb[13].mxu1  ;;  %v979_v50 = vadd.f32 %v742_v39, %v94_v37  ;;  %v1011_v51 = vadd.f32 %v870_v40, %v126_v38 }
 0x116   :  { %v1918_v45 = vpack.c.bf16 %v1345_v33, %v1345_v33  ;;  %v1346_v47 = vmax.f32 %v1282_v36, 0.0  ;;  %v745_v52 = vpop.f32.mrb[14].mxu0  ;;  %v873_v53 = vpop.f32.mrb[14].mxu1 }
 0x117   :  { %1634 = vst.msk [vmem:[#allocation3 + $0x8] sm:$0xf] %vm1631_vm4, %v1886_v43  ;;  %v1887_v54 = vpack.c.bf16 %v1314_v46, %v1314_v46  ;;  %v980_v58 = vadd.f32 %v745_v52, %v95_v41  ;;  %v1012_v59 = vadd.f32 %v873_v53, %v127_v42  ;;  %v747_v60 = vpop.f32.mrb[15].mxu0  ;;  %v875_v61 = vpop.f32.mrb[15].mxu1  ;;  %v98_v43 = vld [vmem:[#allocation2 + $0x50] sm:$0xff] }
 0x118   :  { %1666 = vst.msk [vmem:[#allocation3 + $0x88] sm:$0xf] %vm1631_vm4, %v1918_v45  ;;  %v1919_v55 = vpack.c.bf16 %v1346_v47, %v1346_v47  ;;  %v1109_v56 = vld [vmem:[#allocation2 + $0x20] sm:$0xff]  ;;  %v130_v45 = vld [vmem:[#allocation2 + $0x150] sm:$0xff] }
 0x119   :  { %v1141_v57 = vld [vmem:[#allocation2 + $0x120] sm:$0xff]  ;;  %v1180_v62 = vmul.f32 %v2530_v34, %v1109_v56  ;;  %1044 = vst.msk [vmem:[#allocation2 + $0x30] sm:$0xff] %vm23_vm3, %v979_v50  ;;  %1076 = vst.msk [vmem:[#allocation2 + $0x130] sm:$0xff] %vm23_vm3, %v1011_v51 }
 0x11a   :  { %v1212_v63 = vmul.f32 %v2530_v34, %v1141_v57  ;;  %1635 = vst.msk [vmem:[#allocation3 + $0xc] sm:$0xf] %vm1631_vm4, %v1887_v54  ;;  %1667 = vst.msk [vmem:[#allocation3 + $0x8c] sm:$0xf] %vm1631_vm4, %v1919_v55  ;;  %v1110_v0 = vld [vmem:[#allocation2 + $0x28] sm:$0xff] }
 0x11b   :  { %v1142_v1 = vld [vmem:[#allocation2 + $0x128] sm:$0xff]  ;;  %1045 = vst.msk [vmem:[#allocation2 + $0x38] sm:$0xff] %vm23_vm3, %v980_v58  ;;  %1077 = vst.msk [vmem:[#allocation2 + $0x138] sm:$0xff] %vm23_vm3, %v1012_v59  ;;  %v1251_v2 = vadd.f32 %v2535_v44, %v1180_v62  ;;  %v1181_v4 = vmul.f32 %v2530_v34, %v1110_v0  ;;  %v99_v58 = vld [vmem:[#allocation2 + $0x58] sm:$0xff] }
 0x11c   :  { %v1283_v3 = vadd.f32 %v2535_v44, %v1212_v63  ;;  %v1213_v5 = vmul.f32 %v2530_v34, %v1142_v1  ;;  %v750_v12 = vpop.f32.mrb[16].mxu0  ;;  %v878_v13 = vpop.f32.mrb[16].mxu1  ;;  %v131_v59 = vld [vmem:[#allocation2 + $0x158] sm:$0xff] }
 0x11d   :  { %v1315_v8 = vmax.f32 %v1251_v2, 0.0  ;;  %v1252_v10 = vadd.f32 %v2535_v44, %v1181_v4  ;;  %v981_v16 = vadd.f32 %v750_v12, %v96_v6  ;;  %v1013_v17 = vadd.f32 %v878_v13, %v128_v7  ;;  %v752_v18 = vpop.f32.mrb[17].mxu0  ;;  %v880_v19 = vpop.f32.mrb[17].mxu1 }
 0x11e   :  { %v1347_v9 = vmax.f32 %v1283_v3, 0.0  ;;  %v1284_v11 = vadd.f32 %v2535_v44, %v1213_v5  ;;  %v753_v24 = vpop.f32.mrb[18].mxu0  ;;  %v881_v25 = vpop.f32.mrb[18].mxu1 }
 0x11f   :  { %v1888_v20 = vpack.c.bf16 %v1315_v8, %v1315_v8  ;;  %v1316_v22 = vmax.f32 %v1252_v10, 0.0  ;;  %1046 = vst.msk [vmem:[#allocation2 + $0x40] sm:$0xff] %vm23_vm3, %v981_v16  ;;  %1078 = vst.msk [vmem:[#allocation2 + $0x140] sm:$0xff] %vm23_vm3, %v1013_v17  ;;  %v982_v28 = vadd.f32 %v753_v24, %v97_v14  ;;  %v1014_v29 = vadd.f32 %v881_v25, %v129_v15  ;;  %v755_v30 = vpop.f32.mrb[19].mxu0  ;;  %v883_v31 = vpop.f32.mrb[19].mxu1 }
 0x120   :  { %v1920_v21 = vpack.c.bf16 %v1347_v9, %v1347_v9  ;;  %v1348_v23 = vmax.f32 %v1284_v11, 0.0  ;;  %v1111_v26 = vld [vmem:[#allocation2 + $0x30] sm:$0xff]  ;;  %v101_v30 = vld [vmem:[#allocation2 + $0x68] sm:$0xff] }
 0x121   :  { %v1143_v27 = vld [vmem:[#allocation2 + $0x130] sm:$0xff]  ;;  %1636 = vst.msk [vmem:[#allocation3 + $0x10] sm:$0xf] %vm1631_vm4, %v1888_v20  ;;  %v1889_v32 = vpack.c.bf16 %v1316_v22, %v1316_v22  ;;  %v1182_v35 = vmul.f32 %v2530_v34, %v1111_v26  ;;  %v100_v20 = vld [vmem:[#allocation2 + $0x60] sm:$0xff]  ;;  %v133_v31 = vld [vmem:[#allocation2 + $0x168] sm:$0xff] }
 0x122   :  { %1668 = vst.msk [vmem:[#allocation3 + $0x90] sm:$0xf] %vm1631_vm4, %v1920_v21  ;;  %v1921_v33 = vpack.c.bf16 %v1348_v23, %v1348_v23  ;;  %v1214_v36 = vmul.f32 %v2530_v34, %v1143_v27  ;;  %v1112_v37 = vld [vmem:[#allocation2 + $0x38] sm:$0xff]  ;;  %v132_v21 = vld [vmem:[#allocation2 + $0x160] sm:$0xff] }
 0x123   :  { %v1144_v38 = vld [vmem:[#allocation2 + $0x138] sm:$0xff]  ;;  %v1183_v39 = vmul.f32 %v2530_v34, %v1112_v37  ;;  %1047 = vst.msk [vmem:[#allocation2 + $0x48] sm:$0xff] %vm23_vm3, %v982_v28  ;;  %1079 = vst.msk [vmem:[#allocation2 + $0x148] sm:$0xff] %vm23_vm3, %v1014_v29  ;;  %v1253_v41 = vadd.f32 %v2535_v44, %v1182_v35 }
 0x124   :  { %v1215_v40 = vmul.f32 %v2530_v34, %v1144_v38  ;;  %1637 = vst.msk [vmem:[#allocation3 + $0x14] sm:$0xf] %vm1631_vm4, %v1889_v32  ;;  %1669 = vst.msk [vmem:[#allocation3 + $0x94] sm:$0xf] %vm1631_vm4, %v1921_v33  ;;  %v1285_v42 = vadd.f32 %v2535_v44, %v1214_v36  ;;  %v758_v50 = vpop.f32.mrb[20].mxu0  ;;  %v886_v51 = vpop.f32.mrb[20].mxu1 }
 0x125   :  { %v1254_v46 = vadd.f32 %v2535_v44, %v1183_v39  ;;  %v1317_v48 = vmax.f32 %v1253_v41, 0.0  ;;  %v983_v54 = vadd.f32 %v758_v50, %v98_v43  ;;  %v1015_v55 = vadd.f32 %v886_v51, %v130_v45  ;;  %v760_v56 = vpop.f32.mrb[21].mxu0  ;;  %v888_v57 = vpop.f32.mrb[21].mxu1 }
 0x126   :  { %v1286_v47 = vadd.f32 %v2535_v44, %v1215_v40  ;;  %v1349_v49 = vmax.f32 %v1285_v42, 0.0  ;;  %v1113_v62 = vld [vmem:[#allocation2 + $0x40] sm:$0xff]  ;;  %v761_v0 = vpop.f32.mrb[22].mxu0  ;;  %v889_v1 = vpop.f32.mrb[22].mxu1 }
 0x127   :  { %v1318_v52 = vmax.f32 %v1254_v46, 0.0  ;;  %v1890_v60 = vpack.c.bf16 %v1317_v48, %v1317_v48  ;;  %v1145_v63 = vld [vmem:[#allocation2 + $0x140] sm:$0xff]  ;;  %v1184_v4 = vmul.f32 %v2530_v34, %v1113_v62  ;;  %1048 = vst.msk [vmem:[#allocation2 + $0x50] sm:$0xff] %vm23_vm3, %v983_v54  ;;  %1080 = vst.msk [vmem:[#allocation2 + $0x150] sm:$0xff] %vm23_vm3, %v1015_v55  ;;  %v763_v6 = vpop.f32.mrb[23].mxu0  ;;  %v891_v7 = vpop.f32.mrb[23].mxu1  ;;  %v984_v10 = vadd.f32 %v761_v0, %v99_v58 }
 0x128   :  { %v1350_v53 = vmax.f32 %v1286_v47, 0.0  ;;  %v1922_v61 = vpack.c.bf16 %v1349_v49, %v1349_v49  ;;  %v1216_v5 = vmul.f32 %v2530_v34, %v1145_v63  ;;  %v1016_v11 = vadd.f32 %v889_v1, %v131_v59  ;;  %v102_v54 = vld [vmem:[#allocation2 + $0x70] sm:$0xff]  ;;  %v103_v62 = vld [vmem:[#allocation2 + $0x78] sm:$0xff] }
 0x129   :  { %v1891_v2 = vpack.c.bf16 %v1318_v52, %v1318_v52  ;;  %1638 = vst.msk [vmem:[#allocation3 + $0x18] sm:$0xf] %vm1631_vm4, %v1890_v60  ;;  %v1255_v12 = vadd.f32 %v2535_v44, %v1184_v4  ;;  %v134_v55 = vld [vmem:[#allocation2 + $0x170] sm:$0xff]  ;;  %v135_v63 = vld [vmem:[#allocation2 + $0x178] sm:$0xff] }
 0x12a   :  { %v1923_v3 = vpack.c.bf16 %v1350_v53, %v1350_v53  ;;  %1670 = vst.msk [vmem:[#allocation3 + $0x98] sm:$0xf] %vm1631_vm4, %v1922_v61  ;;  %v1114_v8 = vld [vmem:[#allocation2 + $0x48] sm:$0xff]  ;;  %v1287_v13 = vadd.f32 %v2535_v44, %v1216_v5 }
 0x12b   :  { %v1146_v9 = vld [vmem:[#allocation2 + $0x148] sm:$0xff]  ;;  %1639 = vst.msk [vmem:[#allocation3 + $0x1c] sm:$0xf] %vm1631_vm4, %v1891_v2  ;;  %v1185_v14 = vmul.f32 %v2530_v34, %v1114_v8  ;;  %v1319_v16 = vmax.f32 %v1255_v12, 0.0 }
 0x12c   :  { %1671 = vst.msk [vmem:[#allocation3 + $0x9c] sm:$0xf] %vm1631_vm4, %v1923_v3  ;;  %v1217_v15 = vmul.f32 %v2530_v34, %v1146_v9  ;;  %v1351_v17 = vmax.f32 %v1287_v13, 0.0  ;;  %v766_v22 = vpop.f32.mrb[24].mxu0  ;;  %v894_v23 = vpop.f32.mrb[24].mxu1 }
 0x12d   :  { %1049 = vst.msk [vmem:[#allocation2 + $0x58] sm:$0xff] %vm23_vm3, %v984_v10  ;;  %1081 = vst.msk [vmem:[#allocation2 + $0x158] sm:$0xff] %vm23_vm3, %v1016_v11  ;;  %v1256_v18 = vadd.f32 %v2535_v44, %v1185_v14  ;;  %v1892_v24 = vpack.c.bf16 %v1319_v16, %v1319_v16  ;;  %v768_v28 = vpop.f32.mrb[25].mxu0  ;;  %v896_v29 = vpop.f32.mrb[25].mxu1  ;;  %v985_v35 = vadd.f32 %v766_v22, %v100_v20 }
 0x12e   :  { %v1288_v19 = vadd.f32 %v2535_v44, %v1217_v15  ;;  %v1924_v25 = vpack.c.bf16 %v1351_v17, %v1351_v17  ;;  %v1115_v32 = vld [vmem:[#allocation2 + $0x50] sm:$0xff]  ;;  %v1017_v36 = vadd.f32 %v894_v23, %v132_v21  ;;  %v769_v37 = vpop.f32.mrb[26].mxu0  ;;  %v897_v38 = vpop.f32.mrb[26].mxu1 }
 0x12f   :  { %v1320_v26 = vmax.f32 %v1256_v18, 0.0  ;;  %v1147_v33 = vld [vmem:[#allocation2 + $0x150] sm:$0xff]  ;;  %1640 = vst.msk [vmem:[#allocation3 + $0x20] sm:$0xf] %vm1631_vm4, %v1892_v24  ;;  %v1186_v41 = vmul.f32 %v2530_v34, %v1115_v32  ;;  %v771_v43 = vpop.f32.mrb[27].mxu0  ;;  %v899_v45 = vpop.f32.mrb[27].mxu1  ;;  %v986_v46 = vadd.f32 %v769_v37, %v101_v30  ;;  %v1018_v47 = vadd.f32 %v897_v38, %v133_v31 }
 0x130   :  { %v1352_v27 = vmax.f32 %v1288_v19, 0.0  ;;  %1672 = vst.msk [vmem:[#allocation3 + $0xa0] sm:$0xf] %vm1631_vm4, %v1924_v25  ;;  %v1218_v42 = vmul.f32 %v2530_v34, %v1147_v33 }
 0x131   :  { %v1893_v39 = vpack.c.bf16 %v1320_v26, %v1320_v26  ;;  %1050 = vst.msk [vmem:[#allocation2 + $0x60] sm:$0xff] %vm23_vm3, %v985_v35  ;;  %1082 = vst.msk [vmem:[#allocation2 + $0x160] sm:$0xff] %vm23_vm3, %v1017_v36  ;;  %v1257_v48 = vadd.f32 %v2535_v44, %v1186_v41  ;;  %v104_v26 = vld [vmem:[#allocation2 + $0x80] sm:$0xff]  ;;  %v105_v35 = vld [vmem:[#allocation2 + $0x88] sm:$0xff] }
 0x132   :  { %v1925_v40 = vpack.c.bf16 %v1352_v27, %v1352_v27  ;;  %v1289_v49 = vadd.f32 %v2535_v44, %v1218_v42  ;;  %1051 = vst.msk [vmem:[#allocation2 + $0x68] sm:$0xff] %vm23_vm3, %v986_v46  ;;  %1083 = vst.msk [vmem:[#allocation2 + $0x168] sm:$0xff] %vm23_vm3, %v1018_v47  ;;  %v136_v27 = vld [vmem:[#allocation2 + $0x180] sm:$0xff]  ;;  %v137_v36 = vld [vmem:[#allocation2 + $0x188] sm:$0xff] }
 0x133   :  { %1641 = vst.msk [vmem:[#allocation3 + $0x24] sm:$0xf] %vm1631_vm4, %v1893_v39  ;;  %v1321_v56 = vmax.f32 %v1257_v48, 0.0 }
 0x134   :  { %1673 = vst.msk [vmem:[#allocation3 + $0xa4] sm:$0xf] %vm1631_vm4, %v1925_v40  ;;  %v1116_v50 = vld [vmem:[#allocation2 + $0x58] sm:$0xff]  ;;  %v1353_v57 = vmax.f32 %v1289_v49, 0.0  ;;  %v774_v60 = vpop.f32.mrb[28].mxu0  ;;  %v902_v61 = vpop.f32.mrb[28].mxu1 }
 0x135   :  { %v1148_v51 = vld [vmem:[#allocation2 + $0x158] sm:$0xff]  ;;  %v1187_v52 = vmul.f32 %v2530_v34, %v1116_v50  ;;  %v1894_v0 = vpack.c.bf16 %v1321_v56, %v1321_v56  ;;  %v987_v2 = vadd.f32 %v774_v60, %v102_v54  ;;  %v1019_v3 = vadd.f32 %v902_v61, %v134_v55  ;;  %v776_v4 = vpop.f32.mrb[29].mxu0  ;;  %v904_v5 = vpop.f32.mrb[29].mxu1 }
 0x136   :  { %v1219_v53 = vmul.f32 %v2530_v34, %v1148_v51  ;;  %v1926_v1 = vpack.c.bf16 %v1353_v57, %v1353_v57  ;;  %v777_v8 = vpop.f32.mrb[30].mxu0  ;;  %v905_v9 = vpop.f32.mrb[30].mxu1  ;;  %v106_v4 = vld [vmem:[#allocation2 + $0x90] sm:$0xff] }
 0x137   :  { %v1258_v58 = vadd.f32 %v2535_v44, %v1187_v52  ;;  %1642 = vst.msk [vmem:[#allocation3 + $0x28] sm:$0xf] %vm1631_vm4, %v1894_v0  ;;  %v988_v12 = vadd.f32 %v777_v8, %v103_v62  ;;  %v1020_v13 = vadd.f32 %v905_v9, %v135_v63  ;;  %v779_v14 = vpop.f32.mrb[31].mxu0  ;;  %v907_v15 = vpop.f32.mrb[31].mxu1  ;;  %v138_v5 = vld [vmem:[#allocation2 + $0x190] sm:$0xff] }
 0x138   :  { %v1290_v59 = vadd.f32 %v2535_v44, %v1219_v53  ;;  %1674 = vst.msk [vmem:[#allocation3 + $0xa8] sm:$0xf] %vm1631_vm4, %v1926_v1  ;;  %v1117_v10 = vld [vmem:[#allocation2 + $0x60] sm:$0xff]  ;;  %v107_v14 = vld [vmem:[#allocation2 + $0x98] sm:$0xff] }
 0x139   :  { %v1322_v6 = vmax.f32 %v1258_v58, 0.0  ;;  %v1149_v11 = vld [vmem:[#allocation2 + $0x160] sm:$0xff]  ;;  %1052 = vst.msk [vmem:[#allocation2 + $0x70] sm:$0xff] %vm23_vm3, %v987_v2  ;;  %1084 = vst.msk [vmem:[#allocation2 + $0x170] sm:$0xff] %vm23_vm3, %v1019_v3  ;;  %v1188_v18 = vmul.f32 %v2530_v34, %v1117_v10  ;;  %v1118_v20 = vld [vmem:[#allocation2 + $0x68] sm:$0xff] }
 0x13a   :  { %v1354_v7 = vmax.f32 %v1290_v59, 0.0  ;;  %v1220_v19 = vmul.f32 %v2530_v34, %v1149_v11  ;;  %v1150_v21 = vld [vmem:[#allocation2 + $0x168] sm:$0xff]  ;;  %1053 = vst.msk [vmem:[#allocation2 + $0x78] sm:$0xff] %vm23_vm3, %v988_v12  ;;  %1085 = vst.msk [vmem:[#allocation2 + $0x178] sm:$0xff] %vm23_vm3, %v1020_v13  ;;  %v1189_v24 = vmul.f32 %v2530_v34, %v1118_v20  ;;  %v139_v15 = vld [vmem:[#allocation2 + $0x198] sm:$0xff] }
 0x13b   :  { %v1895_v16 = vpack.c.bf16 %v1322_v6, %v1322_v6  ;;  %v1259_v22 = vadd.f32 %v2535_v44, %v1188_v18  ;;  %v1221_v25 = vmul.f32 %v2530_v34, %v1150_v21 }
 0x13c   :  { %v1927_v17 = vpack.c.bf16 %v1354_v7, %v1354_v7  ;;  %v1291_v23 = vadd.f32 %v2535_v44, %v1220_v19  ;;  %v1260_v30 = vadd.f32 %v2535_v44, %v1189_v24  ;;  %v782_v32 = vpop.f32.mrb[32].mxu0  ;;  %v910_v33 = vpop.f32.mrb[32].mxu1 }
 0x13d   :  { %1643 = vst.msk [vmem:[#allocation3 + $0x2c] sm:$0xf] %vm1631_vm4, %v1895_v16  ;;  %v1323_v28 = vmax.f32 %v1259_v22, 0.0  ;;  %v1292_v31 = vadd.f32 %v2535_v44, %v1221_v25  ;;  %v989_v37 = vadd.f32 %v782_v32, %v104_v26  ;;  %v1021_v38 = vadd.f32 %v910_v33, %v136_v27  ;;  %v784_v39 = vpop.f32.mrb[33].mxu0  ;;  %v912_v40 = vpop.f32.mrb[33].mxu1 }
 0x13e   :  { %1675 = vst.msk [vmem:[#allocation3 + $0xac] sm:$0xf] %vm1631_vm4, %v1927_v17  ;;  %v1355_v29 = vmax.f32 %v1291_v23, 0.0  ;;  %v1324_v43 = vmax.f32 %v1260_v30, 0.0  ;;  %v785_v48 = vpop.f32.mrb[34].mxu0  ;;  %v913_v49 = vpop.f32.mrb[34].mxu1 }
 0x13f   :  { %v1896_v41 = vpack.c.bf16 %v1323_v28, %v1323_v28  ;;  %v1356_v45 = vmax.f32 %v1292_v31, 0.0  ;;  %1054 = vst.msk [vmem:[#allocation2 + $0x80] sm:$0xff] %vm23_vm3, %v989_v37  ;;  %1086 = vst.msk [vmem:[#allocation2 + $0x180] sm:$0xff] %vm23_vm3, %v1021_v38  ;;  %v990_v52 = vadd.f32 %v785_v48, %v105_v35  ;;  %v1022_v53 = vadd.f32 %v913_v49, %v137_v36  ;;  %v787_v54 = vpop.f32.mrb[35].mxu0  ;;  %v915_v55 = vpop.f32.mrb[35].mxu1 }
 0x140   :  { %v1928_v42 = vpack.c.bf16 %v1355_v29, %v1355_v29  ;;  %v1119_v46 = vld [vmem:[#allocation2 + $0x70] sm:$0xff]  ;;  %v1897_v56 = vpack.c.bf16 %v1324_v43, %v1324_v43 }
 0x141   :  { %v1151_v47 = vld [vmem:[#allocation2 + $0x170] sm:$0xff]  ;;  %v1190_v50 = vmul.f32 %v2530_v34, %v1119_v46  ;;  %1644 = vst.msk [vmem:[#allocation3 + $0x30] sm:$0xf] %vm1631_vm4, %v1896_v41  ;;  %v1929_v57 = vpack.c.bf16 %v1356_v45, %v1356_v45  ;;  %v1120_v58 = vld [vmem:[#allocation2 + $0x78] sm:$0xff]  ;;  %v108_v41 = vld [vmem:[#allocation2 + $0xa0] sm:$0xff] }
 0x142   :  { %v1222_v51 = vmul.f32 %v2530_v34, %v1151_v47  ;;  %1676 = vst.msk [vmem:[#allocation3 + $0xb0] sm:$0xf] %vm1631_vm4, %v1928_v42  ;;  %v1152_v59 = vld [vmem:[#allocation2 + $0x178] sm:$0xff]  ;;  %v1191_v62 = vmul.f32 %v2530_v34, %v1120_v58  ;;  %1645 = vst.msk [vmem:[#allocation3 + $0x34] sm:$0xf] %vm1631_vm4, %v1897_v56  ;;  %v140_v42 = vld [vmem:[#allocation2 + $0x1a0] sm:$0xff] }
 0x143   :  { %v1261_v60 = vadd.f32 %v2535_v44, %v1190_v50  ;;  %v1223_v63 = vmul.f32 %v2530_v34, %v1152_v59  ;;  %1055 = vst.msk [vmem:[#allocation2 + $0x88] sm:$0xff] %vm23_vm3, %v990_v52  ;;  %1087 = vst.msk [vmem:[#allocation2 + $0x188] sm:$0xff] %vm23_vm3, %v1022_v53  ;;  %v109_v46 = vld [vmem:[#allocation2 + $0xa8] sm:$0xff] }
 0x144   :  { %v1293_v61 = vadd.f32 %v2535_v44, %v1222_v51  ;;  %1677 = vst.msk [vmem:[#allocation3 + $0xb4] sm:$0xf] %vm1631_vm4, %v1929_v57  ;;  %v1262_v2 = vadd.f32 %v2535_v44, %v1191_v62  ;;  %v790_v6 = vpop.f32.mrb[36].mxu0  ;;  %v918_v7 = vpop.f32.mrb[36].mxu1  ;;  %v141_v47 = vld [vmem:[#allocation2 + $0x1a8] sm:$0xff] }
 0x145   :  { %v1325_v0 = vmax.f32 %v1261_v60, 0.0  ;;  %v1294_v3 = vadd.f32 %v2535_v44, %v1223_v63  ;;  %v792_v12 = vpop.f32.mrb[37].mxu0  ;;  %v920_v13 = vpop.f32.mrb[37].mxu1  ;;  %v991_v18 = vadd.f32 %v790_v6, %v106_v4  ;;  %v1023_v19 = vadd.f32 %v918_v7, %v138_v5 }
 0x146   :  { %v1357_v1 = vmax.f32 %v1293_v61, 0.0  ;;  %v1326_v10 = vmax.f32 %v1262_v2, 0.0  ;;  %v1121_v16 = vld [vmem:[#allocation2 + $0x80] sm:$0xff]  ;;  %v793_v20 = vpop.f32.mrb[38].mxu0  ;;  %v921_v21 = vpop.f32.mrb[38].mxu1 }
 0x147   :  { %v1898_v8 = vpack.c.bf16 %v1325_v0, %v1325_v0  ;;  %v1358_v11 = vmax.f32 %v1294_v3, 0.0  ;;  %v1153_v17 = vld [vmem:[#allocation2 + $0x180] sm:$0xff]  ;;  %v1192_v24 = vmul.f32 %v2530_v34, %v1121_v16  ;;  %v795_v26 = vpop.f32.mrb[39].mxu0  ;;  %v923_v27 = vpop.f32.mrb[39].mxu1  ;;  %1056 = vst.msk [vmem:[#allocation2 + $0x90] sm:$0xff] %vm23_vm3, %v991_v18  ;;  %1088 = vst.msk [vmem:[#allocation2 + $0x190] sm:$0xff] %vm23_vm3, %v1023_v19  ;;  %v992_v30 = vadd.f32 %v793_v20, %v107_v14 }
 0x148   :  { %v1930_v9 = vpack.c.bf16 %v1357_v1, %v1357_v1  ;;  %v1899_v22 = vpack.c.bf16 %v1326_v10, %v1326_v10  ;;  %v1224_v25 = vmul.f32 %v2530_v34, %v1153_v17  ;;  %v1024_v31 = vadd.f32 %v921_v21, %v139_v15  ;;  %v110_v10 = vld [vmem:[#allocation2 + $0xb0] sm:$0xff]  ;;  %v111_v18 = vld [vmem:[#allocation2 + $0xb8] sm:$0xff] }
 0x149   :  { %1646 = vst.msk [vmem:[#allocation3 + $0x38] sm:$0xf] %vm1631_vm4, %v1898_v8  ;;  %v1931_v23 = vpack.c.bf16 %v1358_v11, %v1358_v11  ;;  %v1263_v32 = vadd.f32 %v2535_v44, %v1192_v24  ;;  %v142_v11 = vld [vmem:[#allocation2 + $0x1b0] sm:$0xff]  ;;  %v143_v19 = vld [vmem:[#allocation2 + $0x1b8] sm:$0xff] }
 0x14a   :  { %1678 = vst.msk [vmem:[#allocation3 + $0xb8] sm:$0xf] %vm1631_vm4, %v1930_v9  ;;  %v1122_v28 = vld [vmem:[#allocation2 + $0x88] sm:$0xff]  ;;  %1647 = vst.msk [vmem:[#allocation3 + $0x3c] sm:$0xf] %vm1631_vm4, %v1899_v22  ;;  %v1295_v33 = vadd.f32 %v2535_v44, %v1224_v25 }
 0x14b   :  { %v1154_v29 = vld [vmem:[#allocation2 + $0x188] sm:$0xff]  ;;  %1679 = vst.msk [vmem:[#allocation3 + $0xbc] sm:$0xf] %vm1631_vm4, %v1931_v23  ;;  %v1193_v35 = vmul.f32 %v2530_v34, %v1122_v28  ;;  %v1327_v37 = vmax.f32 %v1263_v32, 0.0 }
 0x14c   :  { %v1225_v36 = vmul.f32 %v2530_v34, %v1154_v29  ;;  %1057 = vst.msk [vmem:[#allocation2 + $0x98] sm:$0xff] %vm23_vm3, %v992_v30  ;;  %1089 = vst.msk [vmem:[#allocation2 + $0x198] sm:$0xff] %vm23_vm3, %v1024_v31  ;;  %v1359_v38 = vmax.f32 %v1295_v33, 0.0  ;;  %v798_v43 = vpop.f32.mrb[40].mxu0  ;;  %v926_v45 = vpop.f32.mrb[40].mxu1 }
 0x14d   :  { %v1264_v39 = vadd.f32 %v2535_v44, %v1193_v35  ;;  %v1900_v48 = vpack.c.bf16 %v1327_v37, %v1327_v37  ;;  %v800_v52 = vpop.f32.mrb[41].mxu0  ;;  %v928_v53 = vpop.f32.mrb[41].mxu1  ;;  %v993_v54 = vadd.f32 %v798_v43, %v108_v41  ;;  %v1025_v55 = vadd.f32 %v926_v45, %v140_v42 }
 0x14e   :  { %v1296_v40 = vadd.f32 %v2535_v44, %v1225_v36  ;;  %v1932_v49 = vpack.c.bf16 %v1359_v38, %v1359_v38  ;;  %v801_v56 = vpop.f32.mrb[42].mxu0  ;;  %v929_v57 = vpop.f32.mrb[42].mxu1  ;;  %v1123_v60 = vld [vmem:[#allocation2 + $0x90] sm:$0xff] }
 0x14f   :  { %v1328_v50 = vmax.f32 %v1264_v39, 0.0  ;;  %1648 = vst.msk [vmem:[#allocation3 + $0x40] sm:$0xf] %vm1631_vm4, %v1900_v48  ;;  %v1155_v61 = vld [vmem:[#allocation2 + $0x190] sm:$0xff]  ;;  %v994_v62 = vadd.f32 %v801_v56, %v109_v46  ;;  %v1026_v63 = vadd.f32 %v929_v57, %v141_v47  ;;  %v803_v0 = vpop.f32.mrb[43].mxu0  ;;  %v931_v1 = vpop.f32.mrb[43].mxu1  ;;  %v1194_v2 = vmul.f32 %v2530_v34, %v1123_v60 }
 0x150   :  { %v1360_v51 = vmax.f32 %v1296_v40, 0.0  ;;  %1680 = vst.msk [vmem:[#allocation3 + $0xc0] sm:$0xf] %vm1631_vm4, %v1932_v49  ;;  %v1226_v3 = vmul.f32 %v2530_v34, %v1155_v61  ;;  %v112_v48 = vld [vmem:[#allocation2 + $0xc0] sm:$0xff] }
 0x151   :  { %v1901_v58 = vpack.c.bf16 %v1328_v50, %v1328_v50  ;;  %1058 = vst.msk [vmem:[#allocation2 + $0xa0] sm:$0xff] %vm23_vm3, %v993_v54  ;;  %1090 = vst.msk [vmem:[#allocation2 + $0x1a0] sm:$0xff] %vm23_vm3, %v1025_v55  ;;  %v1265_v6 = vadd.f32 %v2535_v44, %v1194_v2  ;;  %v144_v49 = vld [vmem:[#allocation2 + $0x1c0] sm:$0xff] }
 0x152   :  { %v1933_v59 = vpack.c.bf16 %v1360_v51, %v1360_v51  ;;  %1059 = vst.msk [vmem:[#allocation2 + $0xa8] sm:$0xff] %vm23_vm3, %v994_v62  ;;  %1091 = vst.msk [vmem:[#allocation2 + $0x1a8] sm:$0xff] %vm23_vm3, %v1026_v63  ;;  %v1297_v7 = vadd.f32 %v2535_v44, %v1226_v3  ;;  %v113_v62 = vld [vmem:[#allocation2 + $0xc8] sm:$0xff] }
 0x153   :  { %1649 = vst.msk [vmem:[#allocation3 + $0x44] sm:$0xf] %vm1631_vm4, %v1901_v58  ;;  %v1124_v4 = vld [vmem:[#allocation2 + $0x98] sm:$0xff]  ;;  %v1329_v12 = vmax.f32 %v1265_v6, 0.0  ;;  %v145_v63 = vld [vmem:[#allocation2 + $0x1c8] sm:$0xff] }
 0x154   :  { %1681 = vst.msk [vmem:[#allocation3 + $0xc4] sm:$0xf] %vm1631_vm4, %v1933_v59  ;;  %v1156_v5 = vld [vmem:[#allocation2 + $0x198] sm:$0xff]  ;;  %v1195_v8 = vmul.f32 %v2530_v34, %v1124_v4  ;;  %v1361_v13 = vmax.f32 %v1297_v7, 0.0  ;;  %v806_v16 = vpop.f32.mrb[44].mxu0  ;;  %v934_v17 = vpop.f32.mrb[44].mxu1 }
 0x155   :  { %v1227_v9 = vmul.f32 %v2530_v34, %v1156_v5  ;;  %v995_v20 = vadd.f32 %v806_v16, %v110_v10  ;;  %v1027_v21 = vadd.f32 %v934_v17, %v142_v11  ;;  %v808_v22 = vpop.f32.mrb[45].mxu0  ;;  %v936_v23 = vpop.f32.mrb[45].mxu1  ;;  %v1902_v24 = vpack.c.bf16 %v1329_v12, %v1329_v12 }
 0x156   :  { %v1266_v14 = vadd.f32 %v2535_v44, %v1195_v8  ;;  %v1934_v25 = vpack.c.bf16 %v1361_v13, %v1361_v13  ;;  %v809_v28 = vpop.f32.mrb[46].mxu0  ;;  %v937_v29 = vpop.f32.mrb[46].mxu1 }
 0x157   :  { %v1298_v15 = vadd.f32 %v2535_v44, %v1227_v9  ;;  %1060 = vst.msk [vmem:[#allocation2 + $0xb0] sm:$0xff] %vm23_vm3, %v995_v20  ;;  %1092 = vst.msk [vmem:[#allocation2 + $0x1b0] sm:$0xff] %vm23_vm3, %v1027_v21  ;;  %v996_v32 = vadd.f32 %v809_v28, %v111_v18  ;;  %v1028_v33 = vadd.f32 %v937_v29, %v143_v19  ;;  %v811_v35 = vpop.f32.mrb[47].mxu0  ;;  %v939_v36 = vpop.f32.mrb[47].mxu1  ;;  %v2723_v19 = vld [vmem:[%s2813_s2] ss:$0 sm:$0xff] }
 0x158   :  { %v1330_v26 = vmax.f32 %v1266_v14, 0.0  ;;  %v1125_v30 = vld [vmem:[#allocation2 + $0xa0] sm:$0xff]  ;;  %1650 = vst.msk [vmem:[#allocation3 + $0x48] sm:$0xf] %vm1631_vm4, %v1902_v24  ;;  %1682 = vst.msk [vmem:[#allocation3 + $0xc8] sm:$0xf] %vm1631_vm4, %v1934_v25 }
 0x159   :  { %v1362_v27 = vmax.f32 %v1298_v15, 0.0  ;;  %v1157_v31 = vld [vmem:[#allocation2 + $0x1a0] sm:$0xff]  ;;  %v1196_v39 = vmul.f32 %v2530_v34, %v1125_v30  ;;  %v1126_v41 = vld [vmem:[#allocation2 + $0xa8] sm:$0xff]  ;;  %1061 = vst.msk [vmem:[#allocation2 + $0xb8] sm:$0xff] %vm23_vm3, %v996_v32  ;;  %1093 = vst.msk [vmem:[#allocation2 + $0x1b8] sm:$0xff] %vm23_vm3, %v1028_v33 }
 0x15a   :  { %v1903_v37 = vpack.c.bf16 %v1330_v26, %v1330_v26  ;;  %v1228_v40 = vmul.f32 %v2530_v34, %v1157_v31  ;;  %v1158_v42 = vld [vmem:[#allocation2 + $0x1a8] sm:$0xff]  ;;  %v1197_v43 = vmul.f32 %v2530_v34, %v1126_v41  ;;  %v114_v25 = vld [vmem:[#allocation2 + $0xd0] sm:$0xff]  ;;  %v115_v35 = vld [vmem:[#allocation2 + $0xd8] sm:$0xff] }
 0x15b   :  { %v1935_v38 = vpack.c.bf16 %v1362_v27, %v1362_v27  ;;  %v1229_v45 = vmul.f32 %v2530_v34, %v1158_v42  ;;  %v1267_v46 = vadd.f32 %v2535_v44, %v1196_v39  ;;  %v146_v26 = vld [vmem:[#allocation2 + $0x1d0] sm:$0xff]  ;;  %v147_v36 = vld [vmem:[#allocation2 + $0x1d8] sm:$0xff] }
 0x15c   :  { %1651 = vst.msk [vmem:[#allocation3 + $0x4c] sm:$0xf] %vm1631_vm4, %v1903_v37  ;;  %v1299_v47 = vadd.f32 %v2535_v44, %v1228_v40  ;;  %v1268_v50 = vadd.f32 %v2535_v44, %v1197_v43  ;;  %v814_v54 = vpop.f32.mrb[48].mxu0  ;;  %v942_v55 = vpop.f32.mrb[48].mxu1 }
 0x15d   :  { %1683 = vst.msk [vmem:[#allocation3 + $0xcc] sm:$0xf] %vm1631_vm4, %v1935_v38  ;;  %v1300_v51 = vadd.f32 %v2535_v44, %v1229_v45  ;;  %v1331_v52 = vmax.f32 %v1267_v46, 0.0  ;;  %v997_v58 = vadd.f32 %v814_v54, %v112_v48  ;;  %v1029_v59 = vadd.f32 %v942_v55, %v144_v49  ;;  %v816_v60 = vpop.f32.mrb[49].mxu0  ;;  %v944_v61 = vpop.f32.mrb[49].mxu1 }
 0x15e   :  { %v1363_v53 = vmax.f32 %v1299_v47, 0.0  ;;  %v1332_v56 = vmax.f32 %v1268_v50, 0.0  ;;  %v1127_v2 = vld [vmem:[#allocation2 + $0xb0] sm:$0xff]  ;;  %v817_v4 = vpop.f32.mrb[50].mxu0  ;;  %v945_v5 = vpop.f32.mrb[50].mxu1 }
 0x15f   :  { %v1364_v57 = vmax.f32 %v1300_v51, 0.0  ;;  %v1904_v0 = vpack.c.bf16 %v1331_v52, %v1331_v52  ;;  %v1159_v3 = vld [vmem:[#allocation2 + $0x1b0] sm:$0xff]  ;;  %v1198_v8 = vmul.f32 %v2530_v34, %v1127_v2  ;;  %1062 = vst.msk [vmem:[#allocation2 + $0xc0] sm:$0xff] %vm23_vm3, %v997_v58  ;;  %1094 = vst.msk [vmem:[#allocation2 + $0x1c0] sm:$0xff] %vm23_vm3, %v1029_v59  ;;  %v819_v10 = vpop.f32.mrb[51].mxu0  ;;  %v947_v11 = vpop.f32.mrb[51].mxu1  ;;  %v998_v14 = vadd.f32 %v817_v4, %v113_v62 }
 0x160   :  { %v1936_v1 = vpack.c.bf16 %v1363_v53, %v1363_v53  ;;  %v1905_v6 = vpack.c.bf16 %v1332_v56, %v1332_v56  ;;  %v1230_v9 = vmul.f32 %v2530_v34, %v1159_v3  ;;  %v1128_v12 = vld [vmem:[#allocation2 + $0xb8] sm:$0xff]  ;;  %v1030_v15 = vadd.f32 %v945_v5, %v145_v63  ;;  %v2741_v51 = vld [vmem:[%s2814_s3] ss:$0 sm:$0xff]  ;;  %v117_v2 = vld [vmem:[#allocation2 + $0xe8] sm:$0xff]  ;;  %s2109_s3 = smov [#allocation3]  }
 0x161   :  { %v1937_v7 = vpack.c.bf16 %v1364_v57, %v1364_v57  ;;  %1652 = vst.msk [vmem:[#allocation3 + $0x50] sm:$0xf] %vm1631_vm4, %v1904_v0  ;;  %v1160_v13 = vld [vmem:[#allocation2 + $0x1b8] sm:$0xff]  ;;  %v1269_v16 = vadd.f32 %v2535_v44, %v1198_v8  ;;  %v1199_v18 = vmul.f32 %v2530_v34, %v1128_v12  ;;  %v116_v58 = vld [vmem:[#allocation2 + $0xe0] sm:$0xff]  ;;  %v149_v3 = vld [vmem:[#allocation2 + $0x1e8] sm:$0xff]  ;;  %s1701_s8 = sshll.u32 %s2109_s3, 4  ;;  %s1702_s8 = int_to_ptr.vmem [resolvable:$true] %s1701_s8 }
 0x162   :  { %1684 = vst.msk [vmem:[#allocation3 + $0xd0] sm:$0xf] %vm1631_vm4, %v1936_v1  ;;  %1653 = vst.msk [vmem:[#allocation3 + $0x54] sm:$0xf] %vm1631_vm4, %v1905_v6  ;;  %v1301_v17 = vadd.f32 %v2535_v44, %v1230_v9  ;;  %v1231_v20 = vmul.f32 %v2723_v19, %v1160_v13  ;;  %v148_v59 = vld [vmem:[#allocation2 + $0x1e0] sm:$0xff]  ;;  %s2082_s9 = scalar_lea.vmem %s1702_s8, 4096  ;;  %p2087_p1 = scmp.lt.s32.totalorder %s1702_s8, %s1702_s8 }
 0x163   :  { %1685 = vst.msk [vmem:[#allocation3 + $0xd4] sm:$0xf] %vm1631_vm4, %v1937_v7  ;;  %v1333_v21 = vmax.f32 %v1269_v16, 0.0  ;;  %v1270_v23 = vadd.f32 %v2535_v44, %v1199_v18  ;;  %p2083_p0 = scmp.ne.s32.totalorder %s1702_s8, %s2082_s9  ;;  %p2088_p2 = scmp.lt.s32.totalorder %s2082_s9, %s2082_s9 }
 0x164   :  { %1063 = vst.msk [vmem:[#allocation2 + $0xc8] sm:$0xff] %vm23_vm3, %v998_v14  ;;  %1095 = vst.msk [vmem:[#allocation2 + $0x1c8] sm:$0xff] %vm23_vm3, %v1030_v15  ;;  %v1365_v22 = vmax.f32 %v1301_v17, 0.0  ;;  %v1302_v24 = vadd.f32 %v2535_v44, %v1231_v20  ;;  %v822_v34 = vpop.f32.mrb[52].mxu0  ;;  %v950_v27 = vpop.f32.mrb[52].mxu1 }
 0x165   :  { %v1906_v28 = vpack.c.bf16 %v1333_v21, %v1333_v21  ;;  %v1334_v30 = vmax.f32 %v1270_v23, 0.0  ;;  %v824_v32 = vpop.f32.mrb[53].mxu0  ;;  %v952_v33 = vpop.f32.mrb[53].mxu1  ;;  %v999_v39 = vadd.f32 %v822_v34, %v114_v25  ;;  %v1031_v40 = vadd.f32 %v950_v27, %v146_v26  ;;  %p2089_p3 = por %p2088_p2, %p2087_p1 }
 0x166   :  { %v1938_v29 = vpack.c.bf16 %v1365_v22, %v1365_v22  ;;  %v1366_v31 = vmax.f32 %v1302_v24, 0.0  ;;  %v1129_v37 = vld [vmem:[#allocation2 + $0xc0] sm:$0xff]  ;;  %v825_v41 = vpop.f32.mrb[54].mxu0  ;;  %v953_v42 = vpop.f32.mrb[54].mxu1 }
 0x167   :  { %v1161_v38 = vld [vmem:[#allocation2 + $0x1c0] sm:$0xff]  ;;  %1654 = vst.msk [vmem:[#allocation3 + $0x58] sm:$0xf] %vm1631_vm4, %v1906_v28  ;;  %v1907_v44 = vpack.c.bf16 %v1334_v30, %v1334_v30  ;;  %v1200_v45 = vmul.f32 %v2723_v19, %v1129_v37  ;;  %v827_v47 = vpop.f32.mrb[55].mxu0  ;;  %v955_v48 = vpop.f32.mrb[55].mxu1  ;;  %v1000_v49 = vadd.f32 %v825_v41, %v115_v35  ;;  %v1032_v50 = vadd.f32 %v953_v42, %v147_v36  ;;  %v118_v30 = vld [vmem:[#allocation2 + $0xf0] sm:$0xff]  ;;  %p2090_p4 = pnand %p2089_p3, %p2083_p0 }
 0x168   :  { %1686 = vst.msk [vmem:[#allocation3 + $0xd8] sm:$0xf] %vm1631_vm4, %v1938_v29  ;;  %v1939_v43 = vpack.c.bf16 %v1366_v31, %v1366_v31  ;;  %v1232_v46 = vmul.f32 %v2723_v19, %v1161_v38  ;;  %v150_v31 = vld [vmem:[#allocation2 + $0x1f0] sm:$0xff] }
 0x169   :  { %1064 = vst.msk [vmem:[#allocation2 + $0xd0] sm:$0xff] %vm23_vm3, %v999_v39  ;;  %1096 = vst.msk [vmem:[#allocation2 + $0x1d0] sm:$0xff] %vm23_vm3, %v1031_v40  ;;  %v1271_v52 = vadd.f32 %v2741_v51, %v1200_v45  ;;  %v119_v39 = vld [vmem:[#allocation2 + $0xf8] sm:$0xff] }
 0x16a   :  { %1655 = vst.msk [vmem:[#allocation3 + $0x5c] sm:$0xf] %vm1631_vm4, %v1907_v44  ;;  %1687 = vst.msk [vmem:[#allocation3 + $0xdc] sm:$0xf] %vm1631_vm4, %v1939_v43  ;;  %v1303_v53 = vadd.f32 %v2741_v51, %v1232_v46  ;;  %v151_v40 = vld [vmem:[#allocation2 + $0x1f8] sm:$0xff] }
 0x16b   :  { %v1130_v54 = vld [vmem:[#allocation2 + $0xc8] sm:$0xff]  ;;  %1065 = vst.msk [vmem:[#allocation2 + $0xd8] sm:$0xff] %vm23_vm3, %v1000_v49  ;;  %1097 = vst.msk [vmem:[#allocation2 + $0x1d8] sm:$0xff] %vm23_vm3, %v1032_v50  ;;  %v1335_v60 = vmax.f32 %v1271_v52, 0.0 }
 0x16c   :  { %v1162_v55 = vld [vmem:[#allocation2 + $0x1c8] sm:$0xff]  ;;  %v1201_v56 = vmul.f32 %v2723_v19, %v1130_v54  ;;  %v1367_v61 = vmax.f32 %v1303_v53, 0.0  ;;  %v830_v0 = vpop.f32.mrb[56].mxu0  ;;  %v958_v1 = vpop.f32.mrb[56].mxu1 }
 0x16d   :  { %v1233_v57 = vmul.f32 %v2723_v19, %v1162_v55  ;;  %v1908_v4 = vpack.c.bf16 %v1335_v60, %v1335_v60  ;;  %v1001_v6 = vadd.f32 %v830_v0, %v116_v58  ;;  %v1033_v7 = vadd.f32 %v958_v1, %v148_v59  ;;  %v832_v8 = vpop.f32.mrb[57].mxu0  ;;  %v960_v9 = vpop.f32.mrb[57].mxu1 }
 0x16e   :  { %v1272_v62 = vadd.f32 %v2741_v51, %v1201_v56  ;;  %v1940_v5 = vpack.c.bf16 %v1367_v61, %v1367_v61  ;;  %v833_v12 = vpop.f32.mrb[58].mxu0  ;;  %v961_v13 = vpop.f32.mrb[58].mxu1 }
 0x16f   :  { %v1304_v63 = vadd.f32 %v2741_v51, %v1233_v57  ;;  %1656 = vst.msk [vmem:[#allocation3 + $0x60] sm:$0xf] %vm1631_vm4, %v1908_v4  ;;  %v1002_v16 = vadd.f32 %v833_v12, %v117_v2  ;;  %v1034_v17 = vadd.f32 %v961_v13, %v149_v3  ;;  %v835_v18 = vpop.f32.mrb[59].mxu0  ;;  %v963_v20 = vpop.f32.mrb[59].mxu1 }
 0x170   :  { %v1336_v10 = vmax.f32 %v1272_v62, 0.0  ;;  %1688 = vst.msk [vmem:[#allocation3 + $0xe0] sm:$0xf] %vm1631_vm4, %v1940_v5  ;;  %v1131_v14 = vld [vmem:[#allocation2 + $0xd0] sm:$0xff] }
 0x171   :  { %v1368_v11 = vmax.f32 %v1304_v63, 0.0  ;;  %v1163_v15 = vld [vmem:[#allocation2 + $0x1d0] sm:$0xff]  ;;  %1066 = vst.msk [vmem:[#allocation2 + $0xe0] sm:$0xff] %vm23_vm3, %v1001_v6  ;;  %1098 = vst.msk [vmem:[#allocation2 + $0x1e0] sm:$0xff] %vm23_vm3, %v1033_v7  ;;  %v1202_v23 = vmul.f32 %v2723_v19, %v1131_v14 }
 0x172   :  { %v1909_v21 = vpack.c.bf16 %v1336_v10, %v1336_v10  ;;  %v1234_v24 = vmul.f32 %v2723_v19, %v1163_v15  ;;  %v1132_v25 = vld [vmem:[#allocation2 + $0xd8] sm:$0xff]  ;;  %1067 = vst.msk [vmem:[#allocation2 + $0xe8] sm:$0xff] %vm23_vm3, %v1002_v16  ;;  %1099 = vst.msk [vmem:[#allocation2 + $0x1e8] sm:$0xff] %vm23_vm3, %v1034_v17 }
 0x173   :  { %v1941_v22 = vpack.c.bf16 %v1368_v11, %v1368_v11  ;;  %v1164_v26 = vld [vmem:[#allocation2 + $0x1d8] sm:$0xff]  ;;  %v1273_v34 = vadd.f32 %v2741_v51, %v1202_v23  ;;  %v1203_v28 = vmul.f32 %v2723_v19, %v1132_v25 }
 0x174   :  { %1657 = vst.msk [vmem:[#allocation3 + $0x64] sm:$0xf] %vm1631_vm4, %v1909_v21  ;;  %v1305_v27 = vadd.f32 %v2741_v51, %v1234_v24  ;;  %v1235_v29 = vmul.f32 %v2723_v19, %v1164_v26  ;;  %v838_v37 = vpop.f32.mrb[60].mxu0  ;;  %v966_v38 = vpop.f32.mrb[60].mxu1 }
 0x175   :  { %1689 = vst.msk [vmem:[#allocation3 + $0xe4] sm:$0xf] %vm1631_vm4, %v1941_v22  ;;  %v1337_v32 = vmax.f32 %v1273_v34, 0.0  ;;  %v1274_v35 = vadd.f32 %v2741_v51, %v1203_v28  ;;  %v1003_v41 = vadd.f32 %v838_v37, %v118_v30  ;;  %v1035_v42 = vadd.f32 %v966_v38, %v150_v31  ;;  %v840_v44 = vpop.f32.mrb[61].mxu0  ;;  %v968_v43 = vpop.f32.mrb[61].mxu1 }
 0x176   :  { %v1369_v33 = vmax.f32 %v1305_v27, 0.0  ;;  %v1306_v36 = vadd.f32 %v2741_v51, %v1235_v29  ;;  %v841_v52 = vpop.f32.mrb[62].mxu0  ;;  %v969_v53 = vpop.f32.mrb[62].mxu1 }
 0x177   :  { %v1910_v45 = vpack.c.bf16 %v1337_v32, %v1337_v32  ;;  %v1338_v47 = vmax.f32 %v1274_v35, 0.0  ;;  %1068 = vst.msk [vmem:[#allocation2 + $0xf0] sm:$0xff] %vm23_vm3, %v1003_v41  ;;  %1100 = vst.msk [vmem:[#allocation2 + $0x1f0] sm:$0xff] %vm23_vm3, %v1035_v42  ;;  %v1004_v56 = vadd.f32 %v841_v52, %v119_v39  ;;  %v1036_v57 = vadd.f32 %v969_v53, %v151_v40  ;;  %v843_v58 = vpop.f32.mrb[63].mxu0  ;;  %v971_v59 = vpop.f32.mrb[63].mxu1 }
 0x178   :  { %v1942_v46 = vpack.c.bf16 %v1369_v33, %v1369_v33  ;;  %v1370_v48 = vmax.f32 %v1306_v36, 0.0  ;;  %v1133_v49 = vld [vmem:[#allocation2 + $0xe0] sm:$0xff] }
 0x179   :  { %v1165_v50 = vld [vmem:[#allocation2 + $0x1e0] sm:$0xff]  ;;  %v1204_v54 = vmul.f32 %v2723_v19, %v1133_v49  ;;  %1658 = vst.msk [vmem:[#allocation3 + $0x68] sm:$0xf] %vm1631_vm4, %v1910_v45  ;;  %v1911_v60 = vpack.c.bf16 %v1338_v47, %v1338_v47  ;;  %v1134_v62 = vld [vmem:[#allocation2 + $0xe8] sm:$0xff] }
 0x17a   :  { %v1236_v55 = vmul.f32 %v2723_v19, %v1165_v50  ;;  %1690 = vst.msk [vmem:[#allocation3 + $0xe8] sm:$0xf] %vm1631_vm4, %v1942_v46  ;;  %v1943_v61 = vpack.c.bf16 %v1370_v48, %v1370_v48  ;;  %v1166_v63 = vld [vmem:[#allocation2 + $0x1e8] sm:$0xff]  ;;  %v1205_v2 = vmul.f32 %v2723_v19, %v1134_v62 }
 0x17b   :  { %v1275_v0 = vadd.f32 %v2741_v51, %v1204_v54  ;;  %v1237_v3 = vmul.f32 %v2723_v19, %v1166_v63  ;;  %1069 = vst.msk [vmem:[#allocation2 + $0xf8] sm:$0xff] %vm23_vm3, %v1004_v56  ;;  %1101 = vst.msk [vmem:[#allocation2 + $0x1f8] sm:$0xff] %vm23_vm3, %v1036_v57 }
 0x17c   :  { %v1307_v1 = vadd.f32 %v2741_v51, %v1236_v55  ;;  %1659 = vst.msk [vmem:[#allocation3 + $0x6c] sm:$0xf] %vm1631_vm4, %v1911_v60  ;;  %1691 = vst.msk [vmem:[#allocation3 + $0xec] sm:$0xf] %vm1631_vm4, %v1943_v61  ;;  %v1276_v6 = vadd.f32 %v2741_v51, %v1205_v2 }
 0x17d   :  { %v1339_v4 = vmax.f32 %v1275_v0, 0.0  ;;  %v1308_v7 = vadd.f32 %v2741_v51, %v1237_v3 }
 0x17e   :  { %v1371_v5 = vmax.f32 %v1307_v1, 0.0  ;;  %v1340_v10 = vmax.f32 %v1276_v6, 0.0  ;;  %v1135_v12 = vld [vmem:[#allocation2 + $0xf0] sm:$0xff] }
 0x17f   :  { %v1912_v8 = vpack.c.bf16 %v1339_v4, %v1339_v4  ;;  %v1372_v11 = vmax.f32 %v1308_v7, 0.0  ;;  %v1167_v13 = vld [vmem:[#allocation2 + $0x1f0] sm:$0xff]  ;;  %v1206_v16 = vmul.f32 %v2723_v19, %v1135_v12 }
 0x180   :  { %v1944_v9 = vpack.c.bf16 %v1371_v5, %v1371_v5  ;;  %v1913_v14 = vpack.c.bf16 %v1340_v10, %v1340_v10  ;;  %v1238_v17 = vmul.f32 %v2723_v19, %v1167_v13 }
 0x181   :  { %1660 = vst.msk [vmem:[#allocation3 + $0x70] sm:$0xf] %vm1631_vm4, %v1912_v8  ;;  %v1945_v15 = vpack.c.bf16 %v1372_v11, %v1372_v11  ;;  %v1277_v21 = vadd.f32 %v2741_v51, %v1206_v16 }
 0x182   :  { %1692 = vst.msk [vmem:[#allocation3 + $0xf0] sm:$0xf] %vm1631_vm4, %v1944_v9  ;;  %v1136_v18 = vld [vmem:[#allocation2 + $0xf8] sm:$0xff]  ;;  %1661 = vst.msk [vmem:[#allocation3 + $0x74] sm:$0xf] %vm1631_vm4, %v1913_v14  ;;  %v1309_v22 = vadd.f32 %v2741_v51, %v1238_v17 }
 0x183   :  { %v1168_v20 = vld [vmem:[#allocation2 + $0x1f8] sm:$0xff]  ;;  %1693 = vst.msk [vmem:[#allocation3 + $0xf4] sm:$0xf] %vm1631_vm4, %v1945_v15  ;;  %v1207_v23 = vmul.f32 %v2723_v19, %v1136_v18  ;;  %v1341_v25 = vmax.f32 %v1277_v21, 0.0 }
 0x184   :  { %v1239_v24 = vmul.f32 %v2723_v19, %v1168_v20  ;;  %v1373_v26 = vmax.f32 %v1309_v22, 0.0 }
 0x185   :  { %v1278_v34 = vadd.f32 %v2741_v51, %v1207_v23  ;;  %v1914_v28 = vpack.c.bf16 %v1341_v25, %v1341_v25 }
 0x186   :  { %v1310_v27 = vadd.f32 %v2741_v51, %v1239_v24  ;;  %v1946_v29 = vpack.c.bf16 %v1373_v26, %v1373_v26 }
 0x187   :  { %v1342_v30 = vmax.f32 %v1278_v34, 0.0  ;;  %1662 = vst.msk [vmem:[#allocation3 + $0x78] sm:$0xf] %vm1631_vm4, %v1914_v28 }
 0x188   :  { %v1374_v31 = vmax.f32 %v1310_v27, 0.0  ;;  %1694 = vst.msk [vmem:[#allocation3 + $0xf8] sm:$0xf] %vm1631_vm4, %v1946_v29 }
 0x189   :  { %v1915_v32 = vpack.c.bf16 %v1342_v30, %v1342_v30 }
 0x18a   :  { %v1947_v33 = vpack.c.bf16 %v1374_v31, %v1374_v31 }
 0x18b   :  { %1663 = vst.msk [vmem:[#allocation3 + $0x7c] sm:$0xf] %vm1631_vm4, %v1915_v32 }
 0x18c   :  { %1695 = vst.msk [vmem:[#allocation3 + $0xfc] sm:$0xf] %vm1631_vm4, %v1947_v33 }
 0x18d   :  { %2093 = shalt.err (!%p2090_p4)
}
 0x18e   :  { %s2094_s12 = scalar_lea.hbm %s2815_s4, 4096 }
 0x18f   :  { %p2095_p5 = scmp.ne.s32.totalorder %s2815_s4, %s2094_s12  ;;  %p2098_p6 = scmp.lt.u32.totalorder %s2094_s12, %s2815_s4 }
 0x191   :  { %p2100_p7 = pnand %p2098_p6, %p2095_p5 }
 0x193   :  { %2103 = shalt.err (!%p2100_p7)
}
 0x194   :  { %s2110_s16 = smov 64   ;;  %s2111_s17 = smov 4  }
 0x195   :  { %1707 = dma.vmem_to_hbm [thread:$0]  %s1702_s8, 4096, %s2815_s4, [#allocation4], %s2110_s16, %s2110_s16, %s2111_s17  }
 0x196   :  { %2104 = dma.done.wait [#allocation4], 4096  }
 0x197   :  { %2105 = vsyncadd [#allocation4], 4294963200 }
 0x198   :  { %1711 = vsyncpa [#allocation4], 1 }

</bundles_post_ra>
